<compile_context>
chip_gen: v7x
topology: tpu7x:2x2x1
jax: 0.10.0
libtpu: 0.0.40
codegen_flags: <defaults>
</compile_context>

<pallas_src>
import functools

import jax
import jax.numpy as jnp
from jax.experimental import pallas as pl
from jax.experimental.pallas import tpu as pltpu

EPS = 1e-5                  # torch.nn.BatchNorm2d default
MATMUL_DTYPE = jnp.float32  # set to jnp.bfloat16 on v6e/v7x for higher MXU
                            # throughput (exceeds the 1e-3 tolerance check below)

_COMPILER_PARAMS = pltpu.CompilerParams(
    dimension_semantics=("parallel",),   # batch grid axis -> megacore on v7x
    vmem_limit_bytes=32 * 1024 * 1024,   # explicit scoped-VMEM budget (safe on v5e/v6e/v7x)
)


def _mxu_dot(a, b):
    return jnp.dot(a.astype(MATMUL_DTYPE), b.astype(MATMUL_DTYPE),
                   preferred_element_type=jnp.float32)


def _channel_stats(y):
    # per-channel partial [sum, sum_of_squares] over this tile's H*W lanes -> (C, 2)
    return jnp.concatenate(
        [jnp.sum(y, axis=1, keepdims=True),
         jnp.sum(y * y, axis=1, keepdims=True)], axis=1)


# ----------------------------- Pallas kernels -----------------------------

def _conv1x1_stats_kernel(x_ref, w_ref, y_ref, st_ref):
    # x: (1, Cin, HW), w: (Cout, Cin) -> y: (1, Cout, HW), st: (1, Cout, 2)
    y = _mxu_dot(w_ref[...], x_ref[0])
    y_ref[0] = y.astype(y_ref.dtype)
    st_ref[0] = _channel_stats(y)


def _bn_relu_conv3x3_stats_kernel(y1_ref, w2_ref, s_ref, b_ref, m_ref,
                                  y2_ref, st_ref, *, width):
    # bn1 + relu applied in-register, then 3x3 conv (pad=1, stride=1) as 9 shifted
    # matmuls over the flattened (C, H*W) tile; shift = static lane slice of a
    # zero-padded copy, with a precomputed validity mask per tap.
    a = jnp.maximum(y1_ref[0] * s_ref[...] + b_ref[...], 0.0)        # (C1, HW)
    c1, hw = a.shape
    c2 = w2_ref.shape[1]
    zpad = jnp.zeros((c1, width + 1), dtype=a.dtype)
    apad = jnp.concatenate([zpad, a, zpad], axis=1)                   # (C1, HW+2W+2)
    acc = jnp.zeros((c2, hw), jnp.float32)
    k = 0
    for dh in (-1, 0, 1):
        for dw in (-1, 0, 1):
            off = (width + 1) + dh * width + dw                       # static
            shifted = apad[:, off:off + hw] * m_ref[k]                # mask invalid taps
            acc = acc + _mxu_dot(w2_ref[k], shifted)
            k += 1
    y2_ref[0] = acc.astype(y2_ref.dtype)
    st_ref[0] = _channel_stats(acc)


def _bn_relu_conv1x1_stats_kernel(y_ref, w_ref, s_ref, b_ref, o_ref, st_ref):
    a = jnp.maximum(y_ref[0] * s_ref[...] + b_ref[...], 0.0)          # (C2, HW)
    y = _mxu_dot(w_ref[...], a)                                       # (C3, HW)
    o_ref[0] = y.astype(o_ref.dtype)
    st_ref[0] = _channel_stats(y)


def _bn_add_relu_kernel(y_ref, x_ref, s_ref, b_ref, o_ref):
    # bn3 + residual add + relu
    o_ref[0] = jnp.maximum(y_ref[0] * s_ref[...] + b_ref[...] + x_ref[0], 0.0)


# ------------------------------- JAX glue ----------------------------------

def _make_shift_masks(h, w):
    """(9, 1, H*W) validity mask for each 3x3 tap (pad=1)."""
    hh = jnp.arange(h).reshape(h, 1)
    ww = jnp.arange(w).reshape(1, w)
    ms = []
    for dh in (-1, 0, 1):
        for dw in (-1, 0, 1):
            valid = ((hh + dh >= 0) & (hh + dh < h) &
                     (ww + dw >= 0) & (ww + dw < w))
            ms.append(valid.reshape(1, 1, h * w))
    return jnp.concatenate(ms, axis=0).astype(jnp.float32)


def _fold_bn(stats, gamma, beta, count):
    """Combine per-tile [sum, sumsq] into BN scale/bias (training-mode, biased var)."""
    tot = jnp.sum(stats, axis=0)                    # (C, 2) over all tiles
    mean = tot[:, 0] / count
    var = tot[:, 1] / count - mean * mean
    scale = gamma * jax.lax.rsqrt(var + EPS)
    bias = beta - mean * scale
    return scale[:, None].astype(jnp.float32), bias[:, None].astype(jnp.float32)


@functools.partial(jax.jit, static_argnames=("stride",))
def bottleneck_forward(x_nchw, params, stride=1):
    """Bottleneck forward with downsample=None (requires inplanes == 4*planes, stride=1)."""
    if stride != 1:
        # TODO(synk): stride>1 (and the downsample branch) is not implemented;
        # downsample=None only yields matching shapes for stride==1 anyway.
        raise NotImplementedError("stride != 1 requires a downsample module")

    n, cin, h, w = x_nchw.shape
    hw = h * w
    planes = params["w1"].shape[0]
    cout = params["w3"].shape[0]                      # = 4 * planes
    if cin != cout:
        raise ValueError("downsample=None requires inplanes == 4 * planes")

    x = x_nchw.reshape(n, cin, hw).astype(jnp.float32)        # free view, no transpose
    w1 = params["w1"][:, :, 0, 0]                             # (planes, cin)
    w2 = jnp.transpose(params["w2"], (2, 3, 0, 1)).reshape(9, planes, planes)
    w3 = params["w3"][:, :, 0, 0]                             # (cout, planes)
    masks = _make_shift_masks(h, w)                           # (9, 1, hw)

    def tile3(c):          # per-image (1, C, HW) block
        return pl.BlockSpec((1, c, hw), lambda i: (i, 0, 0))

    def full2(a, b):       # grid-invariant full 2-D block (weights / scale / bias)
        return pl.BlockSpec((a, b), lambda i: (0, 0))

    def full3(a, b, c):
        return pl.BlockSpec((a, b, c), lambda i: (0, 0, 0))

    def stats_out(c):
        return (pl.BlockSpec((1, c, 2), lambda i: (i, 0, 0)),
                jax.ShapeDtypeStruct((n, c, 2), jnp.float32))

    st1_spec, st1_shape = stats_out(planes)
    st2_spec, st2_shape = stats_out(planes)
    st3_spec, st3_shape = stats_out(cout)

    # ---- stage 1: conv1x1 -> y1 + partial BN stats ----
    y1, st1 = pl.pallas_call(
        _conv1x1_stats_kernel,
        grid=(n,),
        in_specs=[tile3(cin), full2(planes, cin)],
        out_specs=(tile3(planes), st1_spec),
        out_shape=(jax.ShapeDtypeStruct((n, planes, hw), jnp.float32), st1_shape),
        compiler_params=_COMPILER_PARAMS,
    )(x, w1)
    s1, b1 = _fold_bn(st1, params["g1"], params["b1"], n * hw)

    # ---- stage 2: bn1+relu fused into conv3x3 (pad=1) -> y2 + stats ----
    y2, st2 = pl.pallas_call(
        functools.partial(_bn_relu_conv3x3_stats_kernel, width=w),
        grid=(n,),
        in_specs=[tile3(planes), full3(9, planes, planes),
                  full2(planes, 1), full2(planes, 1), full3(9, 1, hw)],
        out_specs=(tile3(planes), st2_spec),
        out_shape=(jax.ShapeDtypeStruct((n, planes, hw), jnp.float32), st2_shape),
        compiler_params=_COMPILER_PARAMS,
    )(y1, w2, s1, b1, masks)
    s2, b2 = _fold_bn(st2, params["g2"], params["b2"], n * hw)

    # ---- stage 3: bn2+relu fused into conv1x1 -> y3 + stats ----
    y3, st3 = pl.pallas_call(
        _bn_relu_conv1x1_stats_kernel,
        grid=(n,),
        in_specs=[tile3(planes), full2(cout, planes),
                  full2(planes, 1), full2(planes, 1)],
        out_specs=(tile3(cout), st3_spec),
        out_shape=(jax.ShapeDtypeStruct((n, cout, hw), jnp.float32), st3_shape),
        compiler_params=_COMPILER_PARAMS,
    )(y2, w3, s2, b2)
    s3, b3 = _fold_bn(st3, params["g3"], params["b3"], n * hw)

    # ---- stage 4: bn3 + residual add + relu ----
    out = pl.pallas_call(
        _bn_add_relu_kernel,
        grid=(n,),
        in_specs=[tile3(cout), tile3(cin), full2(cout, 1), full2(cout, 1)],
        out_specs=tile3(cout),
        out_shape=jax.ShapeDtypeStruct((n, cout, hw), jnp.float32),
        compiler_params=_COMPILER_PARAMS,
    )(y3, x, s3, b3)

    return out.reshape(n, cout, h, w)                 # free view back to NCHW


# ------------------------ pure-JAX reference (check) ------------------------

def _reference_forward(x, params, stride=1):
    def conv(a, w, s, p):
        return jax.lax.conv_general_dilated(
            a, w, (s, s), [(p, p), (p, p)],
            dimension_numbers=("NCHW", "OIHW", "NCHW"))

    def bn(a, g, b):
        mean = jnp.mean(a, axis=(0, 2, 3), keepdims=True)
        var = jnp.mean((a - mean) ** 2, axis=(0, 2, 3), keepdims=True)
        return ((a - mean) * jax.lax.rsqrt(var + EPS)
                * g.reshape(1, -1, 1, 1) + b.reshape(1, -1, 1, 1))

    out = jax.nn.relu(bn(conv(x, params["w1"], 1, 0), params["g1"], params["b1"]))
    out = jax.nn.relu(bn(conv(out, params["w2"], stride, 1), params["g2"], params["b2"]))
    out = bn(conv(out, params["w3"], 1, 0), params["g3"], params["b3"])
    return jax.nn.relu(out + x)


# --------------------------------- main -------------------------------------

if __name__ == "__main__":
    # downsample=None => residual add requires inplanes == planes * expansion, stride == 1
    inplanes, planes, stride = 16, 4, 1
    batch, height, width = 2, 16, 16

    key = jax.random.PRNGKey(0)
    ks = jax.random.split(key, 10)
    params = {
        # conv weights in PyTorch OIHW layout, bias=False
        "w1": 0.1 * jax.random.normal(ks[0], (planes, inplanes, 1, 1), jnp.float32),
        "w2": 0.1 * jax.random.normal(ks[1], (planes, planes, 3, 3), jnp.float32),
        "w3": 0.1 * jax.random.normal(ks[2], (planes * 4, planes, 1, 1), jnp.float32),
        # BatchNorm affine params (gamma, beta)
        "g1": 1.0 + 0.1 * jax.random.normal(ks[3], (planes,), jnp.float32),
        "b1": 0.1 * jax.random.normal(ks[4], (planes,), jnp.float32),
        "g2": 1.0 + 0.1 * jax.random.normal(ks[5], (planes,), jnp.float32),
        "b2": 0.1 * jax.random.normal(ks[6], (planes,), jnp.float32),
        "g3": 1.0 + 0.1 * jax.random.normal(ks[7], (planes * 4,), jnp.float32),
        "b3": 0.1 * jax.random.normal(ks[8], (planes * 4,), jnp.float32),
    }

    x = jax.random.normal(ks[9], (batch, inplanes, height, width), jnp.float32)

    out = bottleneck_forward(x, params, stride=stride)
    out = jax.block_until_ready(out)

    ref = _reference_forward(x, params, stride=stride)
    assert out.shape == ref.shape == (batch, planes * 4, height, width)
    assert jnp.allclose(out, ref, rtol=1e-3, atol=1e-3), \
        f"max abs diff {jnp.max(jnp.abs(out - ref))}"

    print("KERNEL_OK")
</pallas_src>

<mosaic_0001>
module attributes {stable_mosaic.version = 11 : i64} {
  func.func @_conv1x1_stats_kernel(%arg0: i32, %arg1: memref<1x16x256xf32, #tpu.memory_space<vmem>>, %arg2: memref<4x16xf32, #tpu.memory_space<vmem>>, %arg3: memref<1x4x256xf32, #tpu.memory_space<vmem>>, %arg4: memref<1x4x2xf32, #tpu.memory_space<vmem>>) attributes {dimension_semantics = [#tpu.dimension_semantics<parallel>], iteration_bounds = array<i64: 2>, scalar_prefetch = 0 : i64, scratch_operands = 0 : i64, tpu.core_type = #tpu.core_type<tc>, window_params = [{transform_indices = @transform_0, window_bounds = array<i64: 1, 16, 256>}, {pipeline_mode = #tpu.pipeline_mode<synchronous>, transform_indices = @transform_1, window_bounds = array<i64: 4, 16>}, {transform_indices = @transform_2, window_bounds = array<i64: 1, 4, 256>}, {transform_indices = @transform_3, window_bounds = array<i64: 1, 4, 2>}]} {
    %c0 = arith.constant 0 : index
    %c0_0 = arith.constant 0 : index
    %0 = vector.load %arg2[%c0, %c0_0] : memref<4x16xf32, #tpu.memory_space<vmem>>, vector<4x16xf32>
    %c0_1 = arith.constant 0 : index
    %c0_2 = arith.constant 0 : index
    %c0_3 = arith.constant 0 : index
    %1 = vector.load %arg1[%c0_1, %c0_2, %c0_3] : memref<1x16x256xf32, #tpu.memory_space<vmem>>, vector<1x16x256xf32>
    %2 = vector.shape_cast %1 : vector<1x16x256xf32> to vector<16x256xf32>
    %cst = arith.constant dense<0.000000e+00> : vector<4x256xf32>
    %3 = tpu.matmul %0, %2, %cst {dimension_numbers = #tpu.dot_dimension_numbers<[1], [0], [0], [1], [0, 0, 1, 1], [], []>} : vector<4x16xf32>, vector<16x256xf32>, vector<4x256xf32> -> vector<4x256xf32>
    %c0_4 = arith.constant 0 : index
    %c0_5 = arith.constant 0 : index
    %c0_6 = arith.constant 0 : index
    %4 = vector.load %arg3[%c0_4, %c0_5, %c0_6] : memref<1x4x256xf32, #tpu.memory_space<vmem>>, vector<1x4x256xf32>
    %5 = vector.shape_cast %4 : vector<1x4x256xf32> to vector<4x256xf32>
    %6 = vector.shape_cast %3 : vector<4x256xf32> to vector<1x4x256xf32>
    tpu.vector_store %arg3[%c0_4, %c0_5, %c0_6], %6 {strides = array<i32>} : memref<1x4x256xf32, #tpu.memory_space<vmem>>, vector<1x4x256xf32>,
    %cst_7 = arith.constant dense<0.000000e+00> : vector<4xf32>
    %7 = vector.multi_reduction <add>, %3, %cst_7 [1] : vector<4x256xf32> to vector<4xf32>
    %8 = vector.shape_cast %7 : vector<4xf32> to vector<4x1xf32>
    %9 = arith.mulf %3, %3 : vector<4x256xf32>
    %cst_8 = arith.constant dense<0.000000e+00> : vector<4xf32>
    %10 = vector.multi_reduction <add>, %9, %cst_8 [1] : vector<4x256xf32> to vector<4xf32>
    %11 = vector.shape_cast %10 : vector<4xf32> to vector<4x1xf32>
    %12 = tpu.concatenate %8, %11 in 1 : vector<4x1xf32>, vector<4x1xf32> -> vector<4x2xf32>
    %c0_9 = arith.constant 0 : index
    %c0_10 = arith.constant 0 : index
    %c0_11 = arith.constant 0 : index
    %13 = vector.load %arg4[%c0_9, %c0_10, %c0_11] : memref<1x4x2xf32, #tpu.memory_space<vmem>>, vector<1x4x2xf32>
    %14 = vector.shape_cast %13 : vector<1x4x2xf32> to vector<4x2xf32>
    %15 = vector.shape_cast %12 : vector<4x2xf32> to vector<1x4x2xf32>
    tpu.vector_store %arg4[%c0_9, %c0_10, %c0_11], %15 {strides = array<i32>} : memref<1x4x2xf32, #tpu.memory_space<vmem>>, vector<1x4x2xf32>,
    return
  }
  func.func @transform_0(%arg0: i32) -> (i32, i32, i32) {
    %c0_i32 = arith.constant 0 : i32
    %c0_i32_0 = arith.constant 0 : i32
    %c0_i32_1 = arith.constant 0 : i32
    return %arg0, %c0_i32, %c0_i32_0 : i32, i32, i32
  }
  func.func @transform_1(%arg0: i32) -> (i32, i32) {
    %c0_i32 = arith.constant 0 : i32
    %c0_i32_0 = arith.constant 0 : i32
    %c0_i32_1 = arith.constant 0 : i32
    return %c0_i32, %c0_i32_0 : i32, i32
  }
  func.func @transform_2(%arg0: i32) -> (i32, i32, i32) {
    %c0_i32 = arith.constant 0 : i32
    %c0_i32_0 = arith.constant 0 : i32
    %c0_i32_1 = arith.constant 0 : i32
    return %arg0, %c0_i32, %c0_i32_0 : i32, i32, i32
  }
  func.func @transform_3(%arg0: i32) -> (i32, i32, i32) {
    %c0_i32 = arith.constant 0 : i32
    %c0_i32_0 = arith.constant 0 : i32
    %c0_i32_1 = arith.constant 0 : i32
    return %arg0, %c0_i32, %c0_i32_0 : i32, i32, i32
  }
}

module attributes {stable_mosaic.version = 11 : i64} {
  func.func @_bn_relu_conv3x3_stats_kernel(%arg0: i32, %arg1: memref<1x4x256xf32, #tpu.memory_space<vmem>>, %arg2: memref<9x4x4xf32, #tpu.memory_space<vmem>>, %arg3: memref<4x1xf32, #tpu.memory_space<vmem>>, %arg4: memref<4x1xf32, #tpu.memory_space<vmem>>, %arg5: memref<9x1x256xf32, #tpu.memory_space<vmem>>, %arg6: memref<1x4x256xf32, #tpu.memory_space<vmem>>, %arg7: memref<1x4x2xf32, #tpu.memory_space<vmem>>) attributes {dimension_semantics = [#tpu.dimension_semantics<parallel>], iteration_bounds = array<i64: 2>, scalar_prefetch = 0 : i64, scratch_operands = 0 : i64, tpu.core_type = #tpu.core_type<tc>, window_params = [{transform_indices = @transform_0, window_bounds = array<i64: 1, 4, 256>}, {pipeline_mode = #tpu.pipeline_mode<synchronous>, transform_indices = @transform_1, window_bounds = array<i64: 9, 4, 4>}, {pipeline_mode = #tpu.pipeline_mode<synchronous>, transform_indices = @transform_2, window_bounds = array<i64: 4, 1>}, {pipeline_mode = #tpu.pipeline_mode<synchronous>, transform_indices = @transform_3, window_bounds = array<i64: 4, 1>}, {pipeline_mode = #tpu.pipeline_mode<synchronous>, transform_indices = @transform_4, window_bounds = array<i64: 9, 1, 256>}, {transform_indices = @transform_5, window_bounds = array<i64: 1, 4, 256>}, {transform_indices = @transform_6, window_bounds = array<i64: 1, 4, 2>}]} {
    %c0 = arith.constant 0 : index
    %c0_0 = arith.constant 0 : index
    %c0_1 = arith.constant 0 : index
    %0 = vector.load %arg1[%c0, %c0_0, %c0_1] : memref<1x4x256xf32, #tpu.memory_space<vmem>>, vector<1x4x256xf32>
    %1 = vector.shape_cast %0 : vector<1x4x256xf32> to vector<4x256xf32>
    %c0_2 = arith.constant 0 : index
    %c0_3 = arith.constant 0 : index
    %2 = vector.load %arg3[%c0_2, %c0_3] : memref<4x1xf32, #tpu.memory_space<vmem>>, vector<4x1xf32>
    %3 = vector.broadcast %2 : vector<4x1xf32> to vector<4x256xf32>
    %4 = arith.mulf %1, %3 : vector<4x256xf32>
    %c0_4 = arith.constant 0 : index
    %c0_5 = arith.constant 0 : index
    %5 = vector.load %arg4[%c0_4, %c0_5] : memref<4x1xf32, #tpu.memory_space<vmem>>, vector<4x1xf32>
    %6 = vector.broadcast %5 : vector<4x1xf32> to vector<4x256xf32>
    %7 = arith.addf %4, %6 : vector<4x256xf32>
    %cst = arith.constant 0.000000e+00 : f32
    %8 = vector.broadcast %cst : f32 to vector<4x256xf32>
    %9 = arith.maximumf %7, %8 : vector<4x256xf32>
    %cst_6 = arith.constant 0.000000e+00 : f32
    %10 = vector.broadcast %cst_6 : f32 to vector<4x17xf32>
    %11 = tpu.concatenate %10, %9, %10 in 1 : vector<4x17xf32>, vector<4x256xf32>, vector<4x17xf32> -> vector<4x290xf32>
    %cst_7 = arith.constant 0.000000e+00 : f32
    %12 = vector.broadcast %cst_7 : f32 to vector<4x256xf32>
    %13 = vector.extract_strided_slice %11 {offsets = [0, 0], sizes = [4, 256], strides = [1, 1]} : vector<4x290xf32> to vector<4x256xf32>
    %c0_8 = arith.constant 0 : index
    %c0_9 = arith.constant 0 : index
    %c0_10 = arith.constant 0 : index
    %14 = vector.load %arg5[%c0_8, %c0_9, %c0_10] : memref<9x1x256xf32, #tpu.memory_space<vmem>>, vector<1x1x256xf32>
    %15 = vector.shape_cast %14 : vector<1x1x256xf32> to vector<1x256xf32>
    %16 = vector.broadcast %15 : vector<1x256xf32> to vector<4x256xf32>
    %17 = arith.mulf %13, %16 : vector<4x256xf32>
    %c0_11 = arith.constant 0 : index
    %c0_12 = arith.constant 0 : index
    %c0_13 = arith.constant 0 : index
    %18 = vector.load %arg2[%c0_11, %c0_12, %c0_13] : memref<9x4x4xf32, #tpu.memory_space<vmem>>, vector<1x4x4xf32>
    %19 = vector.shape_cast %18 : vector<1x4x4xf32> to vector<4x4xf32>
    %cst_14 = arith.constant dense<0.000000e+00> : vector<4x256xf32>
    %20 = tpu.matmul %19, %17, %cst_14 {dimension_numbers = #tpu.dot_dimension_numbers<[1], [0], [0], [1], [0, 0, 1, 1], [], []>} : vector<4x4xf32>, vector<4x256xf32>, vector<4x256xf32> -> vector<4x256xf32>
    %21 = arith.addf %12, %20 : vector<4x256xf32>
    %22 = vector.extract_strided_slice %11 {offsets = [0, 1], sizes = [4, 256], strides = [1, 1]} : vector<4x290xf32> to vector<4x256xf32>
    %c1 = arith.constant 1 : index
    %c0_15 = arith.constant 0 : index
    %c0_16 = arith.constant 0 : index
    %23 = vector.load %arg5[%c1, %c0_15, %c0_16] : memref<9x1x256xf32, #tpu.memory_space<vmem>>, vector<1x1x256xf32>
    %24 = vector.shape_cast %23 : vector<1x1x256xf32> to vector<1x256xf32>
    %25 = vector.broadcast %24 : vector<1x256xf32> to vector<4x256xf32>
    %26 = arith.mulf %22, %25 : vector<4x256xf32>
    %c1_17 = arith.constant 1 : index
    %c0_18 = arith.constant 0 : index
    %c0_19 = arith.constant 0 : index
    %27 = vector.load %arg2[%c1_17, %c0_18, %c0_19] : memref<9x4x4xf32, #tpu.memory_space<vmem>>, vector<1x4x4xf32>
    %28 = vector.shape_cast %27 : vector<1x4x4xf32> to vector<4x4xf32>
    %cst_20 = arith.constant dense<0.000000e+00> : vector<4x256xf32>
    %29 = tpu.matmul %28, %26, %cst_20 {dimension_numbers = #tpu.dot_dimension_numbers<[1], [0], [0], [1], [0, 0, 1, 1], [], []>} : vector<4x4xf32>, vector<4x256xf32>, vector<4x256xf32> -> vector<4x256xf32>
    %30 = arith.addf %21, %29 : vector<4x256xf32>
    %31 = vector.extract_strided_slice %11 {offsets = [0, 2], sizes = [4, 256], strides = [1, 1]} : vector<4x290xf32> to vector<4x256xf32>
    %c2 = arith.constant 2 : index
    %c0_21 = arith.constant 0 : index
    %c0_22 = arith.constant 0 : index
    %32 = vector.load %arg5[%c2, %c0_21, %c0_22] : memref<9x1x256xf32, #tpu.memory_space<vmem>>, vector<1x1x256xf32>
    %33 = vector.shape_cast %32 : vector<1x1x256xf32> to vector<1x256xf32>
    %34 = vector.broadcast %33 : vector<1x256xf32> to vector<4x256xf32>
    %35 = arith.mulf %31, %34 : vector<4x256xf32>
    %c2_23 = arith.constant 2 : index
    %c0_24 = arith.constant 0 : index
    %c0_25 = arith.constant 0 : index
    %36 = vector.load %arg2[%c2_23, %c0_24, %c0_25] : memref<9x4x4xf32, #tpu.memory_space<vmem>>, vector<1x4x4xf32>
    %37 = vector.shape_cast %36 : vector<1x4x4xf32> to vector<4x4xf32>
    %cst_26 = arith.constant dense<0.000000e+00> : vector<4x256xf32>
    %38 = tpu.matmul %37, %35, %cst_26 {dimension_numbers = #tpu.dot_dimension_numbers<[1], [0], [0], [1], [0, 0, 1, 1], [], []>} : vector<4x4xf32>, vector<4x256xf32>, vector<4x256xf32> -> vector<4x256xf32>
    %39 = arith.addf %30, %38 : vector<4x256xf32>
    %40 = vector.extract_strided_slice %11 {offsets = [0, 16], sizes = [4, 256], strides = [1, 1]} : vector<4x290xf32> to vector<4x256xf32>
    %c3 = arith.constant 3 : index
    %c0_27 = arith.constant 0 : index
    %c0_28 = arith.constant 0 : index
    %41 = vector.load %arg5[%c3, %c0_27, %c0_28] : memref<9x1x256xf32, #tpu.memory_space<vmem>>, vector<1x1x256xf32>
    %42 = vector.shape_cast %41 : vector<1x1x256xf32> to vector<1x256xf32>
    %43 = vector.broadcast %42 : vector<1x256xf32> to vector<4x256xf32>
    %44 = arith.mulf %40, %43 : vector<4x256xf32>
    %c3_29 = arith.constant 3 : index
    %c0_30 = arith.constant 0 : index
    %c0_31 = arith.constant 0 : index
    %45 = vector.load %arg2[%c3_29, %c0_30, %c0_31] : memref<9x4x4xf32, #tpu.memory_space<vmem>>, vector<1x4x4xf32>
    %46 = vector.shape_cast %45 : vector<1x4x4xf32> to vector<4x4xf32>
    %cst_32 = arith.constant dense<0.000000e+00> : vector<4x256xf32>
    %47 = tpu.matmul %46, %44, %cst_32 {dimension_numbers = #tpu.dot_dimension_numbers<[1], [0], [0], [1], [0, 0, 1, 1], [], []>} : vector<4x4xf32>, vector<4x256xf32>, vector<4x256xf32> -> vector<4x256xf32>
    %48 = arith.addf %39, %47 : vector<4x256xf32>
    %49 = vector.extract_strided_slice %11 {offsets = [0, 17], sizes = [4, 256], strides = [1, 1]} : vector<4x290xf32> to vector<4x256xf32>
    %c4 = arith.constant 4 : index
    %c0_33 = arith.constant 0 : index
    %c0_34 = arith.constant 0 : index
    %50 = vector.load %arg5[%c4, %c0_33, %c0_34] : memref<9x1x256xf32, #tpu.memory_space<vmem>>, vector<1x1x256xf32>
    %51 = vector.shape_cast %50 : vector<1x1x256xf32> to vector<1x256xf32>
    %52 = vector.broadcast %51 : vector<1x256xf32> to vector<4x256xf32>
    %53 = arith.mulf %49, %52 : vector<4x256xf32>
    %c4_35 = arith.constant 4 : index
    %c0_36 = arith.constant 0 : index
    %c0_37 = arith.constant 0 : index
    %54 = vector.load %arg2[%c4_35, %c0_36, %c0_37] : memref<9x4x4xf32, #tpu.memory_space<vmem>>, vector<1x4x4xf32>
    %55 = vector.shape_cast %54 : vector<1x4x4xf32> to vector<4x4xf32>
    %cst_38 = arith.constant dense<0.000000e+00> : vector<4x256xf32>
    %56 = tpu.matmul %55, %53, %cst_38 {dimension_numbers = #tpu.dot_dimension_numbers<[1], [0], [0], [1], [0, 0, 1, 1], [], []>} : vector<4x4xf32>, vector<4x256xf32>, vector<4x256xf32> -> vector<4x256xf32>
    %57 = arith.addf %48, %56 : vector<4x256xf32>
    %58 = vector.extract_strided_slice %11 {offsets = [0, 18], sizes = [4, 256], strides = [1, 1]} : vector<4x290xf32> to vector<4x256xf32>
    %c5 = arith.constant 5 : index
    %c0_39 = arith.constant 0 : index
    %c0_40 = arith.constant 0 : index
    %59 = vector.load %arg5[%c5, %c0_39, %c0_40] : memref<9x1x256xf32, #tpu.memory_space<vmem>>, vector<1x1x256xf32>
    %60 = vector.shape_cast %59 : vector<1x1x256xf32> to vector<1x256xf32>
    %61 = vector.broadcast %60 : vector<1x256xf32> to vector<4x256xf32>
    %62 = arith.mulf %58, %61 : vector<4x256xf32>
    %c5_41 = arith.constant 5 : index
    %c0_42 = arith.constant 0 : index
    %c0_43 = arith.constant 0 : index
    %63 = vector.load %arg2[%c5_41, %c0_42, %c0_43] : memref<9x4x4xf32, #tpu.memory_space<vmem>>, vector<1x4x4xf32>
    %64 = vector.shape_cast %63 : vector<1x4x4xf32> to vector<4x4xf32>
    %cst_44 = arith.constant dense<0.000000e+00> : vector<4x256xf32>
    %65 = tpu.matmul %64, %62, %cst_44 {dimension_numbers = #tpu.dot_dimension_numbers<[1], [0], [0], [1], [0, 0, 1, 1], [], []>} : vector<4x4xf32>, vector<4x256xf32>, vector<4x256xf32> -> vector<4x256xf32>
    %66 = arith.addf %57, %65 : vector<4x256xf32>
    %67 = vector.extract_strided_slice %11 {offsets = [0, 32], sizes = [4, 256], strides = [1, 1]} : vector<4x290xf32> to vector<4x256xf32>
    %c6 = arith.constant 6 : index
    %c0_45 = arith.constant 0 : index
    %c0_46 = arith.constant 0 : index
    %68 = vector.load %arg5[%c6, %c0_45, %c0_46] : memref<9x1x256xf32, #tpu.memory_space<vmem>>, vector<1x1x256xf32>
    %69 = vector.shape_cast %68 : vector<1x1x256xf32> to vector<1x256xf32>
    %70 = vector.broadcast %69 : vector<1x256xf32> to vector<4x256xf32>
    %71 = arith.mulf %67, %70 : vector<4x256xf32>
    %c6_47 = arith.constant 6 : index
    %c0_48 = arith.constant 0 : index
    %c0_49 = arith.constant 0 : index
    %72 = vector.load %arg2[%c6_47, %c0_48, %c0_49] : memref<9x4x4xf32, #tpu.memory_space<vmem>>, vector<1x4x4xf32>
    %73 = vector.shape_cast %72 : vector<1x4x4xf32> to vector<4x4xf32>
    %cst_50 = arith.constant dense<0.000000e+00> : vector<4x256xf32>
    %74 = tpu.matmul %73, %71, %cst_50 {dimension_numbers = #tpu.dot_dimension_numbers<[1], [0], [0], [1], [0, 0, 1, 1], [], []>} : vector<4x4xf32>, vector<4x256xf32>, vector<4x256xf32> -> vector<4x256xf32>
    %75 = arith.addf %66, %74 : vector<4x256xf32>
    %76 = vector.extract_strided_slice %11 {offsets = [0, 33], sizes = [4, 256], strides = [1, 1]} : vector<4x290xf32> to vector<4x256xf32>
    %c7 = arith.constant 7 : index
    %c0_51 = arith.constant 0 : index
    %c0_52 = arith.constant 0 : index
    %77 = vector.load %arg5[%c7, %c0_51, %c0_52] : memref<9x1x256xf32, #tpu.memory_space<vmem>>, vector<1x1x256xf32>
    %78 = vector.shape_cast %77 : vector<1x1x256xf32> to vector<1x256xf32>
    %79 = vector.broadcast %78 : vector<1x256xf32> to vector<4x256xf32>
    %80 = arith.mulf %76, %79 : vector<4x256xf32>
    %c7_53 = arith.constant 7 : index
    %c0_54 = arith.constant 0 : index
    %c0_55 = arith.constant 0 : index
    %81 = vector.load %arg2[%c7_53, %c0_54, %c0_55] : memref<9x4x4xf32, #tpu.memory_space<vmem>>, vector<1x4x4xf32>
    %82 = vector.shape_cast %81 : vector<1x4x4xf32> to vector<4x4xf32>
    %cst_56 = arith.constant dense<0.000000e+00> : vector<4x256xf32>
    %83 = tpu.matmul %82, %80, %cst_56 {dimension_numbers = #tpu.dot_dimension_numbers<[1], [0], [0], [1], [0, 0, 1, 1], [], []>} : vector<4x4xf32>, vector<4x256xf32>, vector<4x256xf32> -> vector<4x256xf32>
    %84 = arith.addf %75, %83 : vector<4x256xf32>
    %85 = vector.extract_strided_slice %11 {offsets = [0, 34], sizes = [4, 256], strides = [1, 1]} : vector<4x290xf32> to vector<4x256xf32>
    %c8 = arith.constant 8 : index
    %c0_57 = arith.constant 0 : index
    %c0_58 = arith.constant 0 : index
    %86 = vector.load %arg5[%c8, %c0_57, %c0_58] : memref<9x1x256xf32, #tpu.memory_space<vmem>>, vector<1x1x256xf32>
    %87 = vector.shape_cast %86 : vector<1x1x256xf32> to vector<1x256xf32>
    %88 = vector.broadcast %87 : vector<1x256xf32> to vector<4x256xf32>
    %89 = arith.mulf %85, %88 : vector<4x256xf32>
    %c8_59 = arith.constant 8 : index
    %c0_60 = arith.constant 0 : index
    %c0_61 = arith.constant 0 : index
    %90 = vector.load %arg2[%c8_59, %c0_60, %c0_61] : memref<9x4x4xf32, #tpu.memory_space<vmem>>, vector<1x4x4xf32>
    %91 = vector.shape_cast %90 : vector<1x4x4xf32> to vector<4x4xf32>
    %cst_62 = arith.constant dense<0.000000e+00> : vector<4x256xf32>
    %92 = tpu.matmul %91, %89, %cst_62 {dimension_numbers = #tpu.dot_dimension_numbers<[1], [0], [0], [1], [0, 0, 1, 1], [], []>} : vector<4x4xf32>, vector<4x256xf32>, vector<4x256xf32> -> vector<4x256xf32>
    %93 = arith.addf %84, %92 : vector<4x256xf32>
    %c0_63 = arith.constant 0 : index
    %c0_64 = arith.constant 0 : index
    %c0_65 = arith.constant 0 : index
    %94 = vector.load %arg6[%c0_63, %c0_64, %c0_65] : memref<1x4x256xf32, #tpu.memory_space<vmem>>, vector<1x4x256xf32>
    %95 = vector.shape_cast %94 : vector<1x4x256xf32> to vector<4x256xf32>
    %96 = vector.shape_cast %93 : vector<4x256xf32> to vector<1x4x256xf32>
    tpu.vector_store %arg6[%c0_63, %c0_64, %c0_65], %96 {strides = array<i32>} : memref<1x4x256xf32, #tpu.memory_space<vmem>>, vector<1x4x256xf32>,
    %cst_66 = arith.constant dense<0.000000e+00> : vector<4xf32>
    %97 = vector.multi_reduction <add>, %93, %cst_66 [1] : vector<4x256xf32> to vector<4xf32>
    %98 = vector.shape_cast %97 : vector<4xf32> to vector<4x1xf32>
    %99 = arith.mulf %93, %93 : vector<4x256xf32>
    %cst_67 = arith.constant dense<0.000000e+00> : vector<4xf32>
    %100 = vector.multi_reduction <add>, %99, %cst_67 [1] : vector<4x256xf32> to vector<4xf32>
    %101 = vector.shape_cast %100 : vector<4xf32> to vector<4x1xf32>
    %102 = tpu.concatenate %98, %101 in 1 : vector<4x1xf32>, vector<4x1xf32> -> vector<4x2xf32>
    %c0_68 = arith.constant 0 : index
    %c0_69 = arith.constant 0 : index
    %c0_70 = arith.constant 0 : index
    %103 = vector.load %arg7[%c0_68, %c0_69, %c0_70] : memref<1x4x2xf32, #tpu.memory_space<vmem>>, vector<1x4x2xf32>
    %104 = vector.shape_cast %103 : vector<1x4x2xf32> to vector<4x2xf32>
    %105 = vector.shape_cast %102 : vector<4x2xf32> to vector<1x4x2xf32>
    tpu.vector_store %arg7[%c0_68, %c0_69, %c0_70], %105 {strides = array<i32>} : memref<1x4x2xf32, #tpu.memory_space<vmem>>, vector<1x4x2xf32>,
    return
  }
  func.func @transform_0(%arg0: i32) -> (i32, i32, i32) {
    %c0_i32 = arith.constant 0 : i32
    %c0_i32_0 = arith.constant 0 : i32
    %c0_i32_1 = arith.constant 0 : i32
    return %arg0, %c0_i32, %c0_i32_0 : i32, i32, i32
  }
  func.func @transform_1(%arg0: i32) -> (i32, i32, i32) {
    %c0_i32 = arith.constant 0 : i32
    %c0_i32_0 = arith.constant 0 : i32
    %c0_i32_1 = arith.constant 0 : i32
    %c0_i32_2 = arith.constant 0 : i32
    return %c0_i32, %c0_i32_0, %c0_i32_1 : i32, i32, i32
  }
  func.func @transform_2(%arg0: i32) -> (i32, i32) {
    %c0_i32 = arith.constant 0 : i32
    %c0_i32_0 = arith.constant 0 : i32
    %c0_i32_1 = arith.constant 0 : i32
    return %c0_i32, %c0_i32_0 : i32, i32
  }
  func.func @transform_3(%arg0: i32) -> (i32, i32) {
    %c0_i32 = arith.constant 0 : i32
    %c0_i32_0 = arith.constant 0 : i32
    %c0_i32_1 = arith.constant 0 : i32
    return %c0_i32, %c0_i32_0 : i32, i32
  }
  func.func @transform_4(%arg0: i32) -> (i32, i32, i32) {
    %c0_i32 = arith.constant 0 : i32
    %c0_i32_0 = arith.constant 0 : i32
    %c0_i32_1 = arith.constant 0 : i32
    %c0_i32_2 = arith.constant 0 : i32
    return %c0_i32, %c0_i32_0, %c0_i32_1 : i32, i32, i32
  }
  func.func @transform_5(%arg0: i32) -> (i32, i32, i32) {
    %c0_i32 = arith.constant 0 : i32
    %c0_i32_0 = arith.constant 0 : i32
    %c0_i32_1 = arith.constant 0 : i32
    return %arg0, %c0_i32, %c0_i32_0 : i32, i32, i32
  }
  func.func @transform_6(%arg0: i32) -> (i32, i32, i32) {
    %c0_i32 = arith.constant 0 : i32
    %c0_i32_0 = arith.constant 0 : i32
    %c0_i32_1 = arith.constant 0 : i32
    return %arg0, %c0_i32, %c0_i32_0 : i32, i32, i32
  }
}

module attributes {stable_mosaic.version = 11 : i64} {
  func.func @_bn_relu_conv1x1_stats_kernel(%arg0: i32, %arg1: memref<1x4x256xf32, #tpu.memory_space<vmem>>, %arg2: memref<16x4xf32, #tpu.memory_space<vmem>>, %arg3: memref<4x1xf32, #tpu.memory_space<vmem>>, %arg4: memref<4x1xf32, #tpu.memory_space<vmem>>, %arg5: memref<1x16x256xf32, #tpu.memory_space<vmem>>, %arg6: memref<1x16x2xf32, #tpu.memory_space<vmem>>) attributes {dimension_semantics = [#tpu.dimension_semantics<parallel>], iteration_bounds = array<i64: 2>, scalar_prefetch = 0 : i64, scratch_operands = 0 : i64, tpu.core_type = #tpu.core_type<tc>, window_params = [{transform_indices = @transform_0, window_bounds = array<i64: 1, 4, 256>}, {pipeline_mode = #tpu.pipeline_mode<synchronous>, transform_indices = @transform_1, window_bounds = array<i64: 16, 4>}, {pipeline_mode = #tpu.pipeline_mode<synchronous>, transform_indices = @transform_2, window_bounds = array<i64: 4, 1>}, {pipeline_mode = #tpu.pipeline_mode<synchronous>, transform_indices = @transform_3, window_bounds = array<i64: 4, 1>}, {transform_indices = @transform_4, window_bounds = array<i64: 1, 16, 256>}, {transform_indices = @transform_5, window_bounds = array<i64: 1, 16, 2>}]} {
    %c0 = arith.constant 0 : index
    %c0_0 = arith.constant 0 : index
    %c0_1 = arith.constant 0 : index
    %0 = vector.load %arg1[%c0, %c0_0, %c0_1] : memref<1x4x256xf32, #tpu.memory_space<vmem>>, vector<1x4x256xf32>
    %1 = vector.shape_cast %0 : vector<1x4x256xf32> to vector<4x256xf32>
    %c0_2 = arith.constant 0 : index
    %c0_3 = arith.constant 0 : index
    %2 = vector.load %arg3[%c0_2, %c0_3] : memref<4x1xf32, #tpu.memory_space<vmem>>, vector<4x1xf32>
    %3 = vector.broadcast %2 : vector<4x1xf32> to vector<4x256xf32>
    %4 = arith.mulf %1, %3 : vector<4x256xf32>
    %c0_4 = arith.constant 0 : index
    %c0_5 = arith.constant 0 : index
    %5 = vector.load %arg4[%c0_4, %c0_5] : memref<4x1xf32, #tpu.memory_space<vmem>>, vector<4x1xf32>
    %6 = vector.broadcast %5 : vector<4x1xf32> to vector<4x256xf32>
    %7 = arith.addf %4, %6 : vector<4x256xf32>
    %cst = arith.constant 0.000000e+00 : f32
    %8 = vector.broadcast %cst : f32 to vector<4x256xf32>
    %9 = arith.maximumf %7, %8 : vector<4x256xf32>
    %c0_6 = arith.constant 0 : index
    %c0_7 = arith.constant 0 : index
    %10 = vector.load %arg2[%c0_6, %c0_7] : memref<16x4xf32, #tpu.memory_space<vmem>>, vector<16x4xf32>
    %cst_8 = arith.constant dense<0.000000e+00> : vector<16x256xf32>
    %11 = tpu.matmul %10, %9, %cst_8 {dimension_numbers = #tpu.dot_dimension_numbers<[1], [0], [0], [1], [0, 0, 1, 1], [], []>} : vector<16x4xf32>, vector<4x256xf32>, vector<16x256xf32> -> vector<16x256xf32>
    %c0_9 = arith.constant 0 : index
    %c0_10 = arith.constant 0 : index
    %c0_11 = arith.constant 0 : index
    %12 = vector.load %arg5[%c0_9, %c0_10, %c0_11] : memref<1x16x256xf32, #tpu.memory_space<vmem>>, vector<1x16x256xf32>
    %13 = vector.shape_cast %12 : vector<1x16x256xf32> to vector<16x256xf32>
    %14 = vector.shape_cast %11 : vector<16x256xf32> to vector<1x16x256xf32>
    tpu.vector_store %arg5[%c0_9, %c0_10, %c0_11], %14 {strides = array<i32>} : memref<1x16x256xf32, #tpu.memory_space<vmem>>, vector<1x16x256xf32>,
    %cst_12 = arith.constant dense<0.000000e+00> : vector<16xf32>
    %15 = vector.multi_reduction <add>, %11, %cst_12 [1] : vector<16x256xf32> to vector<16xf32>
    %16 = vector.shape_cast %15 : vector<16xf32> to vector<16x1xf32>
    %17 = arith.mulf %11, %11 : vector<16x256xf32>
    %cst_13 = arith.constant dense<0.000000e+00> : vector<16xf32>
    %18 = vector.multi_reduction <add>, %17, %cst_13 [1] : vector<16x256xf32> to vector<16xf32>
    %19 = vector.shape_cast %18 : vector<16xf32> to vector<16x1xf32>
    %20 = tpu.concatenate %16, %19 in 1 : vector<16x1xf32>, vector<16x1xf32> -> vector<16x2xf32>
    %c0_14 = arith.constant 0 : index
    %c0_15 = arith.constant 0 : index
    %c0_16 = arith.constant 0 : index
    %21 = vector.load %arg6[%c0_14, %c0_15, %c0_16] : memref<1x16x2xf32, #tpu.memory_space<vmem>>, vector<1x16x2xf32>
    %22 = vector.shape_cast %21 : vector<1x16x2xf32> to vector<16x2xf32>
    %23 = vector.shape_cast %20 : vector<16x2xf32> to vector<1x16x2xf32>
    tpu.vector_store %arg6[%c0_14, %c0_15, %c0_16], %23 {strides = array<i32>} : memref<1x16x2xf32, #tpu.memory_space<vmem>>, vector<1x16x2xf32>,
    return
  }
  func.func @transform_0(%arg0: i32) -> (i32, i32, i32) {
    %c0_i32 = arith.constant 0 : i32
    %c0_i32_0 = arith.constant 0 : i32
    %c0_i32_1 = arith.constant 0 : i32
    return %arg0, %c0_i32, %c0_i32_0 : i32, i32, i32
  }
  func.func @transform_1(%arg0: i32) -> (i32, i32) {
    %c0_i32 = arith.constant 0 : i32
    %c0_i32_0 = arith.constant 0 : i32
    %c0_i32_1 = arith.constant 0 : i32
    return %c0_i32, %c0_i32_0 : i32, i32
  }
  func.func @transform_2(%arg0: i32) -> (i32, i32) {
    %c0_i32 = arith.constant 0 : i32
    %c0_i32_0 = arith.constant 0 : i32
    %c0_i32_1 = arith.constant 0 : i32
    return %c0_i32, %c0_i32_0 : i32, i32
  }
  func.func @transform_3(%arg0: i32) -> (i32, i32) {
    %c0_i32 = arith.constant 0 : i32
    %c0_i32_0 = arith.constant 0 : i32
    %c0_i32_1 = arith.constant 0 : i32
    return %c0_i32, %c0_i32_0 : i32, i32
  }
  func.func @transform_4(%arg0: i32) -> (i32, i32, i32) {
    %c0_i32 = arith.constant 0 : i32
    %c0_i32_0 = arith.constant 0 : i32
    %c0_i32_1 = arith.constant 0 : i32
    return %arg0, %c0_i32, %c0_i32_0 : i32, i32, i32
  }
  func.func @transform_5(%arg0: i32) -> (i32, i32, i32) {
    %c0_i32 = arith.constant 0 : i32
    %c0_i32_0 = arith.constant 0 : i32
    %c0_i32_1 = arith.constant 0 : i32
    return %arg0, %c0_i32, %c0_i32_0 : i32, i32, i32
  }
}

module attributes {stable_mosaic.version = 11 : i64} {
  func.func @_bn_add_relu_kernel(%arg0: i32, %arg1: memref<1x16x256xf32, #tpu.memory_space<vmem>>, %arg2: memref<1x16x256xf32, #tpu.memory_space<vmem>>, %arg3: memref<16x1xf32, #tpu.memory_space<vmem>>, %arg4: memref<16x1xf32, #tpu.memory_space<vmem>>, %arg5: memref<1x16x256xf32, #tpu.memory_space<vmem>>) attributes {dimension_semantics = [#tpu.dimension_semantics<parallel>], iteration_bounds = array<i64: 2>, scalar_prefetch = 0 : i64, scratch_operands = 0 : i64, tpu.core_type = #tpu.core_type<tc>, window_params = [{transform_indices = @transform_0, window_bounds = array<i64: 1, 16, 256>}, {transform_indices = @transform_1, window_bounds = array<i64: 1, 16, 256>}, {pipeline_mode = #tpu.pipeline_mode<synchronous>, transform_indices = @transform_2, window_bounds = array<i64: 16, 1>}, {pipeline_mode = #tpu.pipeline_mode<synchronous>, transform_indices = @transform_3, window_bounds = array<i64: 16, 1>}, {transform_indices = @transform_4, window_bounds = array<i64: 1, 16, 256>}]} {
    %c0 = arith.constant 0 : index
    %c0_0 = arith.constant 0 : index
    %c0_1 = arith.constant 0 : index
    %0 = vector.load %arg1[%c0, %c0_0, %c0_1] : memref<1x16x256xf32, #tpu.memory_space<vmem>>, vector<1x16x256xf32>
    %1 = vector.shape_cast %0 : vector<1x16x256xf32> to vector<16x256xf32>
    %c0_2 = arith.constant 0 : index
    %c0_3 = arith.constant 0 : index
    %2 = vector.load %arg3[%c0_2, %c0_3] : memref<16x1xf32, #tpu.memory_space<vmem>>, vector<16x1xf32>
    %3 = vector.broadcast %2 : vector<16x1xf32> to vector<16x256xf32>
    %4 = arith.mulf %1, %3 : vector<16x256xf32>
    %c0_4 = arith.constant 0 : index
    %c0_5 = arith.constant 0 : index
    %5 = vector.load %arg4[%c0_4, %c0_5] : memref<16x1xf32, #tpu.memory_space<vmem>>, vector<16x1xf32>
    %6 = vector.broadcast %5 : vector<16x1xf32> to vector<16x256xf32>
    %7 = arith.addf %4, %6 : vector<16x256xf32>
    %c0_6 = arith.constant 0 : index
    %c0_7 = arith.constant 0 : index
    %c0_8 = arith.constant 0 : index
    %8 = vector.load %arg2[%c0_6, %c0_7, %c0_8] : memref<1x16x256xf32, #tpu.memory_space<vmem>>, vector<1x16x256xf32>
    %9 = vector.shape_cast %8 : vector<1x16x256xf32> to vector<16x256xf32>
    %10 = arith.addf %7, %9 : vector<16x256xf32>
    %cst = arith.constant 0.000000e+00 : f32
    %11 = vector.broadcast %cst : f32 to vector<16x256xf32>
    %12 = arith.maximumf %10, %11 : vector<16x256xf32>
    %c0_9 = arith.constant 0 : index
    %c0_10 = arith.constant 0 : index
    %c0_11 = arith.constant 0 : index
    %13 = vector.load %arg5[%c0_9, %c0_10, %c0_11] : memref<1x16x256xf32, #tpu.memory_space<vmem>>, vector<1x16x256xf32>
    %14 = vector.shape_cast %13 : vector<1x16x256xf32> to vector<16x256xf32>
    %15 = vector.shape_cast %12 : vector<16x256xf32> to vector<1x16x256xf32>
    tpu.vector_store %arg5[%c0_9, %c0_10, %c0_11], %15 {strides = array<i32>} : memref<1x16x256xf32, #tpu.memory_space<vmem>>, vector<1x16x256xf32>,
    return
  }
  func.func @transform_0(%arg0: i32) -> (i32, i32, i32) {
    %c0_i32 = arith.constant 0 : i32
    %c0_i32_0 = arith.constant 0 : i32
    %c0_i32_1 = arith.constant 0 : i32
    return %arg0, %c0_i32, %c0_i32_0 : i32, i32, i32
  }
  func.func @transform_1(%arg0: i32) -> (i32, i32, i32) {
    %c0_i32 = arith.constant 0 : i32
    %c0_i32_0 = arith.constant 0 : i32
    %c0_i32_1 = arith.constant 0 : i32
    return %arg0, %c0_i32, %c0_i32_0 : i32, i32, i32
  }
  func.func @transform_2(%arg0: i32) -> (i32, i32) {
    %c0_i32 = arith.constant 0 : i32
    %c0_i32_0 = arith.constant 0 : i32
    %c0_i32_1 = arith.constant 0 : i32
    return %c0_i32, %c0_i32_0 : i32, i32
  }
  func.func @transform_3(%arg0: i32) -> (i32, i32) {
    %c0_i32 = arith.constant 0 : i32
    %c0_i32_0 = arith.constant 0 : i32
    %c0_i32_1 = arith.constant 0 : i32
    return %c0_i32, %c0_i32_0 : i32, i32
  }
  func.func @transform_4(%arg0: i32) -> (i32, i32, i32) {
    %c0_i32 = arith.constant 0 : i32
    %c0_i32_0 = arith.constant 0 : i32
    %c0_i32_1 = arith.constant 0 : i32
    return %arg0, %c0_i32, %c0_i32_0 : i32, i32, i32
  }
}

</mosaic_0001>

<bundles_post_ra>
// kernel: bottleneck_forward.4
= control target key start
LH: loop header
LB: loop body
LE: loop exit
PB: predicated region body
PF: predicated region fallthrough
CT: control target
= control target key end

     0   :  { %s427_s12 = smov 0   ;;  %s455_s0 = inlined_call_operand.vmem [shape: f32[2,16,256], index: 0, kind: input, shape index: {}]   ;;  %s456_s1 = inlined_call_operand.vmem [shape: f32[4,16], index: 1, kind: input, shape index: {}]   ;;  %s457_s2 = inlined_call_operand.vmem [shape: f32[2,4,256], index: 2, kind: output, shape index: {0}]   ;;  %s458_s3 = inlined_call_operand.vmem [shape: f32[2,4,2], index: 3, kind: output, shape index: {1}]  }
   0x1 LB: > { %s370_s13 = sadd.s32 4294967295, %s404_s12   ;;  %p374_p0 = scmp.ge.s32.totalorder %s404_s12, 1  ;;  %s404_s12 = sphi %s427_s12, %s14_s12  }
   0x2   : > { %p140_p1 = scmp.lt.s32.totalorder %s404_s12, 3 }
   0x4   : > { %p141_p2 = pnand %p374_p0, %p140_p1 }
   0x5   : > { %p168_p3 = scmp.lt.s32.totalorder (!%p141_p2), %s370_s13, 1  ;;  %v406_v0 = vmov (!%p141_p2), 0.0   ;;  %v182_v7 = vld [vmem:[%s456_s1] sm:$0xf] (!%p141_p2)  ;;  %vm187_vm0 = vcmask (!%p141_p2), 130048   ;;  %vm267_vm1 = vcmask (!%p141_p2), 1043456  }
   0x6   : > { %144 = sbr.rel (%p141_p2) target bundleno = 387 (0x183), region = 28  ;;  %255 = vmatprep.mubr.f32.mxu0 (!%p141_p2), %v406_v0  ;;  %vm280_vm2 = vcmask (!%p141_p2), 7168   ;;  %vm282_vm3 = vcmask (!%p141_p2), 11264  }
   0xd   : > { %s460_s13 = smov (!%p168_p3, %s370_s13), 1 }
   0xe   : > { %s383_s14 = sshll.u32 %s460_s13, 5  ;;  %s384_s20 = sshll.u32 %s460_s13, 3 }
   0xf   : > { %s172_s17 = scalar_lea.vmem %s455_s0, %s383_s14  ;;  %s177_s23 = scalar_lea.vmem %s457_s2, %s384_s20 }
  0x10   : > { %v184_v1 = vld [vmem:[%s172_s17 + $0x8] sm:$0xff]  ;;  %v186_v2 = vld [vmem:[%s172_s17 + $0x18] sm:$0xff]  ;;  %v183_v3 = vld [vmem:[%s172_s17] sm:$0xff]  ;;  %s379_s24 = sshll.u32 %s460_s13, 2 }
  0x11   : > { %v385_v4 = vpack.c.bf16 %v186_v2, %v184_v1  ;;  %v185_v5 = vld [vmem:[%s172_s17 + $0x10] sm:$0xff]  ;;  %s181_s27 = scalar_lea.vmem %s458_s3, %s379_s24 }
  0x12   : > { %v387_v6 = vpack.c.bf16 %v185_v5, %v183_v3 }
  0x13   : > { %386 = vmatprep.subr.bf16.mxu0 %v385_v4 }
  0x14   : > { %388 = vmatpush1.bf16.msra.mxu0 %v387_v6 }
  0x17   : > { %380 = vmatmul.mubr.msk.f32.vlgmr.msra.gmra.mrb[0].mxu0 %vm187_vm0, %v182_v7 }
  0xea   : > { %v257_v8 = vpop.f32.mrb[0].mxu0 }
  0xeb   : > { %v273_v9 = vmul.f32 %v257_v8, %v257_v8  ;;  %v259_v10 = vpop.f32.mrb[1].mxu0  ;;  %v268_v11 = vsel %vm267_vm1, %v257_v8, 0.0 }
  0xec   : > { %v264_v12 = vcombine.low %v257_v8, %v259_v10  ;;  %v274_v13 = vmul.f32 %v259_v10, %v259_v10  ;;  %v269_v14 = vsel %vm267_vm1, %v259_v10, 0.0 }
  0xed   : > { %v270_v15 = vadd.f32 %v269_v14, %v268_v11  ;;  %v275_v16 = vsel %vm267_vm1, %v273_v9, 0.0 }
  0xee   : > { %266 = vst [vmem:[%s177_s23] sm:$0xff] %v264_v12  ;;  %v276_v17 = vsel %vm267_vm1, %v274_v13, 0.0 }
  0xef   : > { %271 = vadd.xlane.f32.xlu0 %v270_v15  ;;  %v277_v18 = vadd.f32 %v276_v17, %v275_v16 }
  0xf3   : > { %278 = vadd.xlane.f32.xlu0 %v277_v18 }
 0x17c   : > { %v272_v19 = vpop.xlane.xlu0 %271 }
 0x180   : > { %v279_v20 = vpop.xlane.xlu0 %278 }
 0x181   : > { %v281_v21 = vsel %vm280_vm2, %v272_v19, %v279_v20 }
 0x182   : > { %283 = vst.msk [vmem:[%s181_s27] sm:$0xf] %vm282_vm3, %v281_v21 }
 0x183 PF: > { %s14_s12 = sadd.s32 1, %s404_s12  }
 0x184   : > { %p11_p4 = scmp.ge.s32.totalorder %s14_s12, 4  }
 0x186   :  { %13 = sbr.rel (!%p11_p4) target bundleno = 1 (0x1), region = 70 }

// kernel: bottleneck_forward.6
= control target key start
LH: loop header
LB: loop body
LE: loop exit
PB: predicated region body
PF: predicated region fallthrough
CT: control target
= control target key end

     0   :  { %s550_s18 = smov 0   ;;  %s587_s0 = inlined_call_operand.vmem [shape: f32[2,4,256], index: 0, kind: input, shape index: {}]   ;;  %s588_s1 = inlined_call_operand.vmem [shape: f32[16,4], index: 1, kind: input, shape index: {}]   ;;  %s589_s2 = inlined_call_operand.vmem [shape: f32[4,1], index: 2, kind: input, shape index: {}]   ;;  %s590_s3 = inlined_call_operand.vmem [shape: f32[4,1], index: 3, kind: input, shape index: {}]   ;;  %s591_s4 = inlined_call_operand.vmem [shape: f32[2,16,256], index: 4, kind: output, shape index: {0}]   ;;  %s592_s5 = inlined_call_operand.vmem [shape: f32[2,16,2], index: 5, kind: output, shape index: {1}]  }
   0x1 LB: > { %s475_s19 = sadd.s32 4294967295, %s515_s18   ;;  %p479_p0 = scmp.ge.s32.totalorder %s515_s18, 1  ;;  %s515_s18 = sphi %s550_s18, %s16_s18  }
   0x2   : > { %p190_p1 = scmp.lt.s32.totalorder %s515_s18, 3 }
   0x4   : > { %p191_p2 = pnand %p479_p0, %p190_p1 }
   0x5   : > { %v239_v0 = vld [vmem:[%s589_s2] sm:$0xf] (!%p191_p2)  ;;  %v517_v1 = vmov (!%p191_p2), 0   ;;  %v518_v3 = vmov (!%p191_p2), 0.0   ;;  %p223_p3 = scmp.lt.s32.totalorder (!%p191_p2), %s475_s19, 1  ;;  %v247_v6 = vlaneseq (!%p191_p2)  ;;  %vm279_vm0 = vcmask (!%p191_p2), 1043456  }
   0x6   : > { %194 = sbr.rel (%p191_p2) target bundleno = 516 (0x204), region = 36  ;;  %508 = vset.pattern.permute.xlu0 (!%p191_p2), %v517_v1  ;;  %v253_v2 = vld [vmem:[%s590_s3] sm:$0xf] (!%p191_p2)  ;;  %348 = vmatprep.mubr.f32.mxu0 (!%p191_p2), %v518_v3  ;;  %v519_v4 = vmov (!%p191_p2), 839922192   ;;  %vm272_vm1 = vcmask (!%p191_p2), 31744  }
   0x7   : > { %242 = vperm.xlu0 (!%p191_p2), %508, %v239_v0   ;;  %354 = vmatprep.mubr.f32.mxu1 (!%p191_p2), %v518_v3  ;;  %v245_v5 = vunpack.c.l.s4 (!%p191_p2), %v519_v4  ;;  %v248_v8 = vshrl.u32 (!%p191_p2), %v247_v6, 7  ;;  %v268_v19 = vld [vmem:[%s588_s1] sm:$0xff] (!%p191_p2)  ;;  %v269_v20 = vld [vmem:[%s588_s1 + $0x8] sm:$0xff] (!%p191_p2)  ;;  %vm381_vm2 = vcmask (!%p191_p2), 7168   ;;  %vm384_vm3 = vcmask (!%p191_p2), 15360  }
   0x9   : > { %v246_v7 = vunpack.c.0.s8 (!%p191_p2), %v245_v5 }
   0xb   : > { %256 = vperm.xlu0 (!%p191_p2), %508, %v253_v2   ;;  %v249_v9 = vsub.s32 (!%p191_p2), %v246_v7, %v248_v8 }
   0xd   : > { %s594_s19 = smov (!%p223_p3, %s475_s19), 1 }
   0xe   : > { %s492_s24 = sshll.u32 %s594_s19, 3  ;;  %s493_s7 = sshll.u32 %s594_s19, 5 }
   0xf   : > { %s227_s27 = scalar_lea.vmem %s587_s0, %s492_s24  ;;  %s232_s10 = scalar_lea.vmem %s591_s4, %s493_s7 }
  0x10   : > { %v238_v12 = vld [vmem:[%s227_s27] sm:$0xff]  ;;  %s494_s11 = sshll.u32 %s594_s19, 4 }
  0x11   : > { %s237_s14 = scalar_lea.vmem %s592_s5, %s494_s11 }
  0x86   : > { %v243_v10 = vpop.permute.xlu0 %242 }
  0x87   : > { %v250_v11 = vrot.slane %v243_v10, %v249_v9 }
  0x89   : > { %v252_v14 = vmul.f32 %v250_v11, %v238_v12 }
  0x8a   : > { %v257_v13 = vpop.permute.xlu0 %256 }
  0x8b   : > { %v264_v15 = vrot.slane %v257_v13, %v249_v9 }
  0x8d   : > { %v266_v16 = vadd.f32 %v264_v15, %v252_v14 }
  0x8f   : > { %v267_v17 = vmax.f32 %v266_v16, 0.0 }
  0x91   : > { %v271_v18 = vcombine.high %v267_v17, %v267_v17 }
  0x93   : > { %486 = vmatprep.subr.msk.mxu0 %vm279_vm0, %v271_v18  ;;  %495 = vmatprep.subr.msk.mxu1 %vm279_vm0, %v271_v18 }
  0x94   : > { %487 = vmatpush1.msk.msra.mxu0 %vm279_vm0, %v267_v17  ;;  %496 = vmatpush1.msk.msra.mxu1 %vm279_vm0, %v267_v17 }
  0x95   : > { %488 = vmatmul.mubr.msk.f32.vlgmr.msra.gmra.mrb[0].mxu0 %vm272_vm1, %v268_v19  ;;  %489 = vmatmul.mubr.msk.f32.vlgmr.msra.gmra.mrb[0].mxu1 %vm272_vm1, %v269_v20 }
 0x168   : > { %v350_v21 = vpop.f32.mrb[0].mxu0  ;;  %v356_v22 = vpop.f32.mrb[0].mxu1 }
 0x169   : > { %361 = vst [vmem:[%s232_s10] sm:$0xff] %v350_v21  ;;  %v352_v23 = vpop.f32.mrb[1].mxu0  ;;  %363 = vst [vmem:[%s232_s10 + $0x10] sm:$0xff] %v356_v22  ;;  %v358_v24 = vpop.f32.mrb[1].mxu1  ;;  %v371_v25 = vmul.f32 %v350_v21, %v350_v21  ;;  %v373_v26 = vmul.f32 %v356_v22, %v356_v22 }
 0x16a   : > { %362 = vst [vmem:[%s232_s10 + $0x8] sm:$0xff] %v352_v23  ;;  %v372_v27 = vmul.f32 %v352_v23, %v352_v23  ;;  %364 = vst [vmem:[%s232_s10 + $0x18] sm:$0xff] %v358_v24  ;;  %v374_v28 = vmul.f32 %v358_v24, %v358_v24  ;;  %v365_v29 = vadd.f32 %v352_v23, %v350_v21 }
 0x16b   : > { %v368_v30 = vadd.f32 %v358_v24, %v356_v22 }
 0x16c   : > { %366 = vadd.xlane.f32.xlu1 %v365_v29  ;;  %v375_v31 = vadd.f32 %v372_v27, %v371_v25  ;;  %v378_v32 = vadd.f32 %v374_v28, %v373_v26 }
 0x16e   : > { %376 = vadd.xlane.f32.xlu0 %v375_v31 }
 0x170   : > { %369 = vadd.xlane.f32.xlu1 %v368_v30 }
 0x174   : > { %379 = vadd.xlane.f32.xlu1 %v378_v32 }
 0x1f9   : > { %v367_v33 = vpop.xlane.xlu1 %366 }
 0x1fb   : > { %v377_v34 = vpop.xlane.xlu0 %376 }
 0x1fc   : > { %v382_v35 = vsel %vm381_vm2, %v367_v33, %v377_v34 }
 0x1fd   : > { %385 = vst.msk [vmem:[%s237_s14] sm:$0xff] %vm384_vm3, %v382_v35  ;;  %v370_v36 = vpop.xlane.xlu1 %369 }
 0x201   : > { %v380_v37 = vpop.xlane.xlu1 %379 }
 0x202   : > { %v383_v38 = vsel %vm381_vm2, %v370_v36, %v380_v37 }
 0x203   : > { %386 = vst.msk [vmem:[%s237_s14 + $0x8] sm:$0xff] %vm384_vm3, %v383_v38 }
 0x204 PF: > { %s16_s18 = sadd.s32 1, %s515_s18  }
 0x205   : > { %p13_p4 = scmp.ge.s32.totalorder %s16_s18, 4  }
 0x207   :  { %15 = sbr.rel (!%p13_p4) target bundleno = 1 (0x1), region = 78 }

// kernel: bottleneck_forward.7
= control target key start
LH: loop header
LB: loop body
LE: loop exit
PB: predicated region body
PF: predicated region fallthrough
CT: control target
= control target key end

     0   :  { %s398_s15 = smov 0   ;;  %s430_s0 = inlined_call_operand.vmem [shape: f32[2,16,256], index: 0, kind: input, shape index: {}]   ;;  %s431_s1 = inlined_call_operand.vmem [shape: f32[2,16,256], index: 1, kind: input, shape index: {}]   ;;  %s432_s2 = inlined_call_operand.vmem [shape: f32[16,1], index: 2, kind: input, shape index: {}]   ;;  %s433_s3 = inlined_call_operand.vmem [shape: f32[16,1], index: 3, kind: input, shape index: {}]   ;;  %s434_s4 = inlined_call_operand.vmem [shape: f32[2,16,256], index: 4, kind: output, shape index: {}]  }
   0x1 LB: > { %s337_s16 = sadd.s32 4294967295, %s370_s15   ;;  %p341_p0 = scmp.ge.s32.totalorder %s370_s15, 1  ;;  %s370_s15 = sphi %s398_s15, %s14_s15  }
   0x2   : > { %p172_p1 = scmp.lt.s32.totalorder %s370_s15, 3 }
   0x4   : > { %p173_p2 = pnand %p341_p0, %p172_p1 }
   0x5   : > { %v238_v0 = vld [vmem:[%s433_s3] sm:$0xff] (!%p173_p2)  ;;  %v372_v2 = vmov (!%p173_p2), 0   ;;  %v239_v3 = vld [vmem:[%s433_s3 + $0x8] sm:$0xff] (!%p173_p2)  ;;  %p203_p3 = scmp.lt.s32.totalorder (!%p173_p2), %s337_s16, 1 }
   0x6   : > { %176 = sbr.rel (%p173_p2) target bundleno = 148 (0x94), region = 36  ;;  %v222_v1 = vld [vmem:[%s432_s2] sm:$0xff] (!%p173_p2)  ;;  %363 = vset.pattern.permute.xlu1 (!%p173_p2), %v372_v2  ;;  %362 = vset.pattern.permute.xlu0 (!%p173_p2), %v372_v2  ;;  %v223_v4 = vld [vmem:[%s432_s2 + $0x8] sm:$0xff] (!%p173_p2) }
   0x7   : > { %242 = vperm.xlu1 (!%p173_p2), %363, %v238_v0   ;;  %226 = vperm.xlu0 (!%p173_p2), %362, %v222_v1  }
   0xb   : > { %247 = vperm.xlu1 (!%p173_p2), %363, %v239_v3   ;;  %231 = vperm.xlu0 (!%p173_p2), %362, %v223_v4  }
   0xd   : > { %s436_s16 = smov (!%p203_p3, %s337_s16), 1 }
   0xe   : > { %s350_s25 = sshll.u32 %s436_s16, 5 }
   0xf   : > { %s207_s28 = scalar_lea.vmem %s430_s0, %s350_s25  ;;  %s212_s5 = scalar_lea.vmem %s431_s1, %s350_s25 }
  0x10   : > { %v218_v5 = vld [vmem:[%s207_s28] sm:$0xff]  ;;  %v219_v6 = vld [vmem:[%s207_s28 + $0x8] sm:$0xff]  ;;  %v220_v13 = vld [vmem:[%s207_s28 + $0x10] sm:$0xff]  ;;  %s217_s8 = scalar_lea.vmem %s434_s4, %s350_s25 }
  0x11   : > { %v254_v11 = vld [vmem:[%s212_s5] sm:$0xff]  ;;  %v255_v12 = vld [vmem:[%s212_s5 + $0x8] sm:$0xff]  ;;  %v221_v14 = vld [vmem:[%s207_s28 + $0x18] sm:$0xff] }
  0x12   : > { %v256_v23 = vld [vmem:[%s212_s5 + $0x10] sm:$0xff]  ;;  %v257_v24 = vld [vmem:[%s212_s5 + $0x18] sm:$0xff] }
  0x86   : > { %v243_v7 = vpop.permute.xlu1 %242  ;;  %v227_v8 = vpop.permute.xlu0 %226 }
  0x87   : > { %v234_v9 = vmul.f32 %v227_v8, %v218_v5  ;;  %v235_v10 = vmul.f32 %v227_v8, %v219_v6 }
  0x89   : > { %v250_v15 = vadd.f32 %v243_v7, %v234_v9  ;;  %v251_v16 = vadd.f32 %v243_v7, %v235_v10 }
  0x8a   : > { %v232_v17 = vpop.permute.xlu0 %231  ;;  %v248_v22 = vpop.permute.xlu1 %247 }
  0x8b   : > { %v258_v18 = vadd.f32 %v254_v11, %v250_v15  ;;  %v259_v19 = vadd.f32 %v255_v12, %v251_v16  ;;  %v236_v20 = vmul.f32 %v232_v17, %v220_v13  ;;  %v237_v21 = vmul.f32 %v232_v17, %v221_v14 }
  0x8d   : > { %v262_v25 = vmax.f32 %v258_v18, 0.0  ;;  %v263_v26 = vmax.f32 %v259_v19, 0.0  ;;  %v252_v27 = vadd.f32 %v248_v22, %v236_v20  ;;  %v253_v28 = vadd.f32 %v248_v22, %v237_v21 }
  0x8f   : > { %266 = vst [vmem:[%s217_s8] sm:$0xff] %v262_v25  ;;  %267 = vst [vmem:[%s217_s8 + $0x8] sm:$0xff] %v263_v26  ;;  %v260_v29 = vadd.f32 %v256_v23, %v252_v27  ;;  %v261_v30 = vadd.f32 %v257_v24, %v253_v28 }
  0x91   : > { %v264_v31 = vmax.f32 %v260_v29, 0.0  ;;  %v265_v32 = vmax.f32 %v261_v30, 0.0 }
  0x93   : > { %268 = vst [vmem:[%s217_s8 + $0x10] sm:$0xff] %v264_v31  ;;  %269 = vst [vmem:[%s217_s8 + $0x18] sm:$0xff] %v265_v32 }
  0x94 PF: > { %s14_s15 = sadd.s32 1, %s370_s15  }
  0x95   : > { %p11_p4 = scmp.ge.s32.totalorder %s14_s15, 4  }
  0x97   :  { %13 = sbr.rel (!%p11_p4) target bundleno = 1 (0x1), region = 69 }

// kernel: bottleneck_forward.5
= control target key start
LH: loop header
LB: loop body
LE: loop exit
PB: predicated region body
PF: predicated region fallthrough
CT: control target
= control target key end

     0   :  { %s1605_s21 = smov 0   ;;  %s1820_s0 = inlined_call_operand.vmem [shape: f32[2,4,256], index: 0, kind: input, shape index: {}]   ;;  %s1821_s1 = inlined_call_operand.vmem [shape: f32[9,4,4], index: 1, kind: input, shape index: {}]   ;;  %s1822_s2 = inlined_call_operand.vmem [shape: f32[4,1], index: 2, kind: input, shape index: {}]   ;;  %s1823_s3 = inlined_call_operand.vmem [shape: f32[4,1], index: 3, kind: input, shape index: {}]   ;;  %s1824_s4 = inlined_call_operand.vmem [shape: f32[9,1,256], index: 4, kind: input, shape index: {}]   ;;  %s1825_s5 = inlined_call_operand.vmem [shape: f32[2,4,256], index: 5, kind: output, shape index: {0}]   ;;  %s1826_s6 = inlined_call_operand.vmem [shape: f32[2,4,2], index: 6, kind: output, shape index: {1}]  }
   0x1 LB: > { %s1442_s22 = sadd.s32 4294967295, %s1549_s21   ;;  %p1446_p0 = scmp.ge.s32.totalorder %s1549_s21, 1  ;;  %s1549_s21 = sphi %s1605_s21, %s17_s21  }
   0x2   : > { %p215_p1 = scmp.lt.s32.totalorder %s1549_s21, 3 }
   0x4   : > { %p216_p2 = pnand %p1446_p0, %p215_p1 }
   0x5   : > { %v264_v0 = vld [vmem:[%s1822_s2] sm:$0xf] (!%p216_p2)  ;;  %v272_v1 = vlaneseq (!%p216_p2)  ;;  %v1551_v2 = vmov (!%p216_p2), 0   ;;  %v1470_v5 = vld [vmem:[%s1824_s4 + $0x8] sm:$0x3] (!%p216_p2)  ;;  %s1552_s7 = smov (!%p216_p2), 17  }
   0x6   : > { %219 = sbr.rel (%p216_p2) target bundleno = 788 (0x314), region = 40  ;;  %1542 = vset.pattern.permute.xlu0 (!%p216_p2), %v1551_v2  ;;  %v278_v4 = vld [vmem:[%s1823_s3] sm:$0xf] (!%p216_p2)  ;;  %v1475_v12 = vld [vmem:[%s1824_s4 + $0xa] sm:$0x3] (!%p216_p2)  ;;  %s1553_s10 = smov (!%p216_p2), 1  }
   0x7   : > { %267 = vperm.xlu0 (!%p216_p2), %1542, %v264_v0   ;;  %v273_v3 = vshrl.u32 (!%p216_p2), %v272_v1, 7  ;;  %v1452_v9 = vld [vmem:[%s1824_s4 + $0x2] sm:$0x3] (!%p216_p2)  ;;  %v1480_v14 = vld [vmem:[%s1824_s4 + $0xc] sm:$0x3] (!%p216_p2)  ;;  %s1554_s13 = smov (!%p216_p2), 18  }
   0x8   : > { %v1460_v16 = vld [vmem:[%s1824_s4 + $0x4] sm:$0x3] (!%p216_p2)  ;;  %s1555_s16 = smov (!%p216_p2), 32   ;;  %v1485_v18 = vld [vmem:[%s1824_s4 + $0xe] sm:$0x3] (!%p216_p2)  ;;  %s1556_s19 = smov (!%p216_p2), 2  }
   0x9   : > { %v1622_v6 = vsub.s32 (!%p216_p2), 0, %v273_v3  ;;  %v1624_v7 = vsub.s32 (!%p216_p2), 1, %v273_v3  ;;  %v1465_v20 = vld [vmem:[%s1824_s4 + $0x6] sm:$0x3] (!%p216_p2)  ;;  %s1557_s24 = smov (!%p216_p2), 33   ;;  %s1558_s27 = smov (!%p216_p2), 16  }
   0xa   : > { %v1490_v22 = vld [vmem:[%s1824_s4 + $0x10] sm:$0x3] (!%p216_p2)  ;;  %s1559_s28 = smov (!%p216_p2), 34   ;;  %p249_p3 = scmp.lt.s32.totalorder (!%p216_p2), %s1442_s22, 1  ;;  %v1560_v24 = vmov (!%p216_p2), 839922192  }
   0xb   : > { %281 = vperm.xlu0 (!%p216_p2), %1542, %v278_v4   ;;  %v758_v8 = vrot.slane (!%p216_p2), %v1470_v5, %v1622_v6  ;;  %v762_v10 = vrot.slane (!%p216_p2), %v1470_v5, %v1624_v7  ;;  %v327_v11 = vrot.slane (!%p216_p2), %v1452_v9, %v1622_v6  ;;  %v874_v13 = vrot.slane (!%p216_p2), %v1475_v12, %v1622_v6  ;;  %s1564_s11 = smov (!%p216_p2), 110   ;;  %s1565_s12 = smov (!%p216_p2), 96  }
   0xc   : > { %v991_v15 = vrot.slane (!%p216_p2), %v1480_v14, %v1622_v6  ;;  %v524_v17 = vrot.slane (!%p216_p2), %v1460_v16, %v1622_v6  ;;  %v1108_v19 = vrot.slane (!%p216_p2), %v1485_v18, %v1622_v6  ;;  %v641_v21 = vrot.slane (!%p216_p2), %v1465_v20, %v1622_v6  ;;  %s1567_s14 = smov (!%p216_p2), 95   ;;  %s1568_s15 = smov (!%p216_p2), 112  }
   0xd   : > { %765 = vrot.lane.b32.xlu1 %v762_v10, %s1552_s7  ;;  %v1225_v23 = vrot.slane %v1490_v22, %v1622_v6  ;;  %v270_v25 = vunpack.c.l.s4 %v1560_v24  ;;  %s1828_s22 = smov (!%p249_p3, %s1442_s22), 1  ;;  %v331_v37 = vrot.slane %v1452_v9, %v1624_v7  ;;  %v878_v38 = vrot.slane %v1475_v12, %v1624_v7 }
   0xe   : > { %s1497_s29 = sshll.u32 %s1828_s22, 3  ;;  %v995_v39 = vrot.slane %v1480_v14, %v1624_v7  ;;  %v528_v40 = vrot.slane %v1460_v16, %v1624_v7  ;;  %v1112_v41 = vrot.slane %v1485_v18, %v1624_v7  ;;  %v645_v42 = vrot.slane %v1465_v20, %v1624_v7 }
   0xf   : > { %763 = vrot.lane.b32.xlu0 %v758_v8, %s1552_s7  ;;  %v271_v26 = vunpack.c.0.s8 %v270_v25  ;;  %s253_s9 = scalar_lea.vmem %s1820_s0, %s1497_s29  ;;  %v1229_v43 = vrot.slane %v1490_v22, %v1624_v7  ;;  %vm299_vm0 = vcmask 138240   ;;  %v1563_v54 = vmov 0.0   ;;  %s258_s18 = scalar_lea.vmem %s1825_s5, %s1497_s29 }
  0x10   : > { %v263_v30 = vld [vmem:[%s253_s9] sm:$0xff]  ;;  %859 = vmatprep.mubr.f32.mxu0 %v1563_v54  ;;  %431 = vmatprep.mubr.f32.mxu1 %v1563_v54  ;;  %vm336_vm1 = vcmask 7168   ;;  %vm883_vm2 = vcmask 146432   ;;  %vm1000_vm3 = vcmask 261120   ;;  %vm533_vm4 = vcmask 15360  }
  0x11   : > { %v274_v27 = vsub.s32 %v271_v26, %v273_v3  ;;  %vm1117_vm5 = vcmask 269312   ;;  %vm650_vm6 = vcmask 130048   ;;  %vm1234_vm7 = vcmask 277504  }
  0x12   : > { %vm785_vm8 = vcmask 908288   ;;  %vm362_vm9 = vcmask 1043456   ;;  %vm358_vm10 = vcmask 31744   ;;  %vm355_vm11 = vcmask 1039360  }
  0x13   : > { %332 = vrot.lane.b32.xlu0 %v327_v11, %s1553_s10  ;;  %vm902_vm12 = vcmask 900096   ;;  %vm1019_vm13 = vcmask 785408   ;;  %vm552_vm14 = vcmask 1031168   ;;  %vm1136_vm15 = vcmask 777216  }
  0x17   : > { %879 = vrot.lane.b32.xlu0 %v874_v13, %s1554_s13 }
  0x1b   : > { %996 = vrot.lane.b32.xlu0 %v991_v15, %s1555_s16 }
  0x1f   : > { %529 = vrot.lane.b32.xlu0 %v524_v17, %s1556_s19 }
  0x23   : > { %1113 = vrot.lane.b32.xlu0 %v1108_v19, %s1557_s24 }
  0x27   : > { %646 = vrot.lane.b32.xlu0 %v641_v21, %s1558_s27 }
  0x2b   : > { %1230 = vrot.lane.b32.xlu0 %v1225_v23, %s1559_s28 }
  0x7f   : > { %v766_v46 = vpop.permute.xlu1 %765 }
  0x86   : > { %v268_v28 = vpop.permute.xlu0 %267 }
  0x87   : > { %v275_v29 = vrot.slane %v268_v28, %v274_v27 }
  0x89   : > { %v277_v32 = vmul.f32 %v275_v29, %v263_v30 }
  0x8a   : > { %v282_v31 = vpop.permute.xlu0 %281 }
  0x8b   : > { %v289_v33 = vrot.slane %v282_v31, %v274_v27 }
  0x8d   : > { %v291_v34 = vadd.f32 %v289_v33, %v277_v32 }
  0x8e   : > { %v764_v44 = vpop.permute.xlu0 %763 }
  0x8f   : > { %v292_v35 = vmax.f32 %v291_v34, 0.0  ;;  %v767_v60 = vsel %vm299_vm0, %v764_v44, %v766_v46 }
  0x91   : > { %295 = vrot.lane.b32.xlu1 %v292_v35, %s1552_s7  ;;  %v294_v36 = vcombine.high %v292_v35, %v292_v35 }
  0x92   : > { %v333_v45 = vpop.permute.xlu0 %332 }
  0x95   : > { %297 = vrot.lane.b32.xlu1 %v294_v36, %s1552_s7  ;;  %s1561_s7 = smov 111  }
  0x96   : > { %v880_v47 = vpop.permute.xlu0 %879 }
  0x99   : > { %334 = vrot.lane.b32.xlu1 %v331_v37, %s1553_s10  ;;  %s1562_s10 = smov 127  }
  0x9a   : > { %v997_v53 = vpop.permute.xlu0 %996 }
  0x9d   : > { %881 = vrot.lane.b32.xlu1 %v878_v38, %s1554_s13  ;;  %s1566_s13 = smov 126  }
  0x9e   : > { %v530_v3 = vpop.permute.xlu0 %529 }
  0xa1   : > { %998 = vrot.lane.b32.xlu1 %v995_v39, %s1555_s16  ;;  %s1569_s16 = smov 94  }
  0xa2   : > { %v1114_v11 = vpop.permute.xlu0 %1113 }
  0xa5   : > { %531 = vrot.lane.b32.xlu1 %v528_v40, %s1556_s19  ;;  %s1451_s19 = sshll.u32 %s1828_s22, 2 }
  0xa6   : > { %v647_v23 = vpop.permute.xlu0 %646  ;;  %s262_s29 = scalar_lea.vmem %s1826_s6, %s1451_s19 }
  0xa9   : > { %1115 = vrot.lane.b32.xlu1 %v1112_v41, %s1557_s24 }
  0xaa   : > { %v1231_v28 = vpop.permute.xlu0 %1230 }
  0xad   : > { %648 = vrot.lane.b32.xlu1 %v645_v42, %s1558_s27  ;;  %v306_v42 = vld [vmem:[%s1824_s4] sm:$0x3] }
  0xb1   : > { %1232 = vrot.lane.b32.xlu1 %v1229_v43, %s1559_s28 }
 0x103   : > { %v296_v48 = vpop.permute.xlu1 %295 }
 0x104   : > { %v1694_v49 = vsel %vm299_vm0, 0.0, %v296_v48 }
 0x105   : > { %v771_v50 = vmul.f32 %v764_v44, %v1694_v49  ;;  %v341_v51 = vmul.f32 %v333_v45, %v1694_v49  ;;  %v888_v55 = vmul.f32 %v880_v47, %v1694_v49  ;;  %v1005_v56 = vmul.f32 %v997_v53, %v1694_v49 }
 0x106   : > { %v538_v12 = vmul.f32 %v530_v3, %v1694_v49  ;;  %v1122_v13 = vmul.f32 %v1114_v11, %v1694_v49  ;;  %v1239_v34 = vmul.f32 %v1231_v28, %v1694_v49  ;;  %v655_v35 = vmul.f32 %v647_v23, %v1694_v49 }
 0x107   : > { %779 = vrot.lane.b32.xlu0 %v771_v50, %s1561_s7  ;;  %349 = vrot.lane.b32.xlu1 %v341_v51, %s1562_s10  ;;  %v298_v52 = vpop.permute.xlu1 %297 }
 0x108   : > { %v1703_v57 = vsel %vm299_vm0, %v296_v48, %v298_v52  ;;  %v1706_v58 = vsel %vm299_vm0, %v298_v52, 0.0  ;;  %vm669_vm0 = vcmask 916480  }
 0x109   : > { %v773_v61 = vmul.f32 %v766_v46, %v1706_v58  ;;  %v772_v62 = vmul.f32 %v767_v60, %v1703_v57  ;;  %v315_v46 = vrot.slane %v306_v42, %v1624_v7  ;;  %v1476_v60 = vld [vmem:[%s1821_s1 + $0x14] sm:$0xf] }
 0x10b   : > { %896 = vrot.lane.b32.xlu0 %v888_v55, %s1564_s11  ;;  %1013 = vrot.lane.b32.xlu1 %v1005_v56, %s1565_s12  ;;  %v335_v59 = vpop.permute.xlu1 %334  ;;  %v319_v7 = vmul.f32 %v315_v46, %v1703_v57 }
 0x10c   : > { %v337_v63 = vsel %vm336_vm1, %v333_v45, %v335_v59  ;;  %v343_v2 = vmul.f32 %v335_v59, %v1706_v58  ;;  %v1471_v45 = vld [vmem:[%s1821_s1 + $0x10] sm:$0xf] }
 0x10d   : > { %v342_v1 = vmul.f32 %v337_v63, %v1703_v57 }
 0x10f   : > { %783 = vrot.lane.b32.xlu1 %v773_v61, %s1561_s7  ;;  %781 = vrot.lane.b32.xlu0 %v772_v62, %s1561_s7  ;;  %v882_v0 = vpop.permute.xlu1 %881  ;;  %v320_v61 = vld [vmem:[%s1821_s1] sm:$0xf] }
 0x110   : > { %v884_v4 = vsel %vm883_vm2, %v880_v47, %v882_v0  ;;  %v890_v9 = vmul.f32 %v882_v0, %v1706_v58  ;;  %v311_v47 = vrot.slane %v306_v42, %v1622_v6  ;;  %vm1253_vm2 = vcmask 769024  }
 0x111   : > { %v889_v8 = vmul.f32 %v884_v4, %v1703_v57 }
 0x112   : > { %v318_v6 = vmul.f32 %v311_v47, %v1694_v49 }
 0x113   : > { %353 = vrot.lane.b32.xlu0 %v343_v2, %s1562_s10  ;;  %351 = vrot.lane.b32.xlu1 %v342_v1, %s1562_s10  ;;  %v999_v5 = vpop.permute.xlu1 %998  ;;  %v1481_v2 = vld [vmem:[%s1821_s1 + $0x18] sm:$0xf] }
 0x114   : > { %v1001_v14 = vsel %vm1000_vm3, %v997_v53, %v999_v5  ;;  %v1007_v17 = vmul.f32 %v999_v5, %v1706_v58  ;;  %v1453_v53 = vld [vmem:[%s1821_s1 + $0x4] sm:$0xf]  ;;  %vm1354_vm3 = vcmask 11264  }
 0x115   : > { %v1006_v16 = vmul.f32 %v1001_v14, %v1703_v57  ;;  %v1486_v14 = vld [vmem:[%s1821_s1 + $0x1c] sm:$0xf] }
 0x117   : > { %900 = vrot.lane.b32.xlu0 %v890_v9, %s1564_s11  ;;  %898 = vrot.lane.b32.xlu1 %v889_v8, %s1564_s11  ;;  %v532_v10 = vpop.permute.xlu1 %531  ;;  %v1461_v9 = vld [vmem:[%s1821_s1 + $0x8] sm:$0xf] }
 0x118   : > { %v534_v18 = vsel %vm533_vm4, %v530_v3, %v532_v10  ;;  %v540_v20 = vmul.f32 %v532_v10, %v1706_v58 }
 0x119   : > { %v539_v19 = vmul.f32 %v534_v18, %v1703_v57 }
 0x11b   : > { %546 = vrot.lane.b32.xlu0 %v538_v12, %s1566_s13  ;;  %1130 = vrot.lane.b32.xlu1 %v1122_v13, %s1567_s14  ;;  %v1116_v15 = vpop.permute.xlu1 %1115 }
 0x11c   : > { %v1118_v22 = vsel %vm1117_vm5, %v1114_v11, %v1116_v15  ;;  %v1124_v25 = vmul.f32 %v1116_v15, %v1706_v58 }
 0x11d   : > { %v1123_v24 = vmul.f32 %v1118_v22, %v1703_v57 }
 0x11f   : > { %1017 = vrot.lane.b32.xlu0 %v1007_v17, %s1565_s12  ;;  %1015 = vrot.lane.b32.xlu1 %v1006_v16, %s1565_s12  ;;  %v649_v21 = vpop.permute.xlu1 %648 }
 0x120   : > { %v651_v26 = vsel %vm650_vm6, %v647_v23, %v649_v21  ;;  %v657_v30 = vmul.f32 %v649_v21, %v1706_v58  ;;  %v1466_v23 = vld [vmem:[%s1821_s1 + $0xc] sm:$0xf] }
 0x121   : > { %v656_v29 = vmul.f32 %v651_v26, %v1703_v57 }
 0x123   : > { %550 = vrot.lane.b32.xlu1 %v540_v20, %s1566_s13  ;;  %548 = vrot.lane.b32.xlu0 %v539_v19, %s1566_s13  ;;  %v1233_v27 = vpop.permute.xlu1 %1232 }
 0x124   : > { %v1235_v31 = vsel %vm1234_vm7, %v1231_v28, %v1233_v27  ;;  %v1241_v33 = vmul.f32 %v1233_v27, %v1706_v58 }
 0x125   : > { %v1240_v32 = vmul.f32 %v1235_v31, %v1703_v57 }
 0x127   : > { %1134 = vrot.lane.b32.xlu1 %v1124_v25, %s1567_s14  ;;  %1132 = vrot.lane.b32.xlu0 %v1123_v24, %s1567_s14  ;;  %v1491_v24 = vld [vmem:[%s1821_s1 + $0x20] sm:$0xf] }
 0x12b   : > { %667 = vrot.lane.b32.xlu1 %v657_v30, %s1568_s15  ;;  %665 = vrot.lane.b32.xlu0 %v656_v29, %s1568_s15 }
 0x12f   : > { %1251 = vrot.lane.b32.xlu1 %v1241_v33, %s1569_s16  ;;  %1249 = vrot.lane.b32.xlu0 %v1240_v32, %s1569_s16 }
 0x133   : > { %1247 = vrot.lane.b32.xlu1 %v1239_v34, %s1569_s16  ;;  %663 = vrot.lane.b32.xlu0 %v655_v35, %s1568_s15 }
 0x179   : > { %v780_v36 = vpop.permute.xlu0 %779  ;;  %v350_v37 = vpop.permute.xlu1 %349 }
 0x17d   : > { %v897_v38 = vpop.permute.xlu0 %896  ;;  %v1014_v39 = vpop.permute.xlu1 %1013 }
 0x181   : > { %v782_v40 = vpop.permute.xlu0 %781  ;;  %v784_v41 = vpop.permute.xlu1 %783 }
 0x182   : > { %v787_v43 = vsel %vm785_vm8, %v782_v40, %v784_v41  ;;  %v786_v44 = vsel %vm785_vm8, %v780_v36, %v782_v40 }
 0x183   : > { %1472 = vmatprep.subr.msk.mxu0 %vm362_vm9, %v787_v43 }
 0x184   : > { %1473 = vmatpush1.msk.msra.mxu0 %vm362_vm9, %v786_v44 }
 0x185   : > { %v354_v48 = vpop.permute.xlu0 %353  ;;  %v352_v50 = vpop.permute.xlu1 %351  ;;  %1474 = vmatmul.mubr.msk.f32.vlgmr.msra.gmra.mrb[0].mxu0 %vm358_vm10, %v1471_v45 }
 0x186   : > { %v357_v51 = vsel %vm355_vm11, %v352_v50, %v354_v48  ;;  %v356_v52 = vsel %vm355_vm11, %v350_v37, %v352_v50  ;;  %976 = vmatprep.mubr.f32.mxu0 %v1563_v54 }
 0x187   : > { %1454 = vmatprep.subr.msk.mxu1 %vm362_vm9, %v357_v51 }
 0x188   : > { %1455 = vmatpush1.msk.msra.mxu1 %vm362_vm9, %v356_v52 }
 0x189   : > { %v901_v55 = vpop.permute.xlu0 %900  ;;  %1457 = vmatprep.subr.msk.mxu1 %vm362_vm9, %v319_v7  ;;  %v899_v56 = vpop.permute.xlu1 %898  ;;  %1456 = vmatmul.mubr.msk.f32.vlgmr.msra.gmra.mrb[0].mxu1 %vm358_vm10, %v1453_v53 }
 0x18a   : > { %v903_v58 = vsel %vm902_vm12, %v897_v38, %v899_v56  ;;  %v904_v59 = vsel %vm902_vm12, %v899_v56, %v901_v55  ;;  %1458 = vmatpush1.msk.msra.mxu1 %vm362_vm9, %v318_v6  ;;  %511 = vmatprep.mubr.f32.mxu1 %v1563_v54 }
 0x18b   : > { %1477 = vmatprep.subr.msk.mxu0 %vm362_vm9, %v904_v59 }
 0x18c   : > { %1478 = vmatpush1.msk.msra.mxu0 %vm362_vm9, %v903_v58 }
 0x18d   : > { %v547_v49 = vpop.permute.xlu0 %546  ;;  %v1131_v57 = vpop.permute.xlu1 %1130  ;;  %1479 = vmatmul.mubr.msk.f32.vlgmr.msra.gmra.mrb[0].mxu0 %vm358_vm10, %v1476_v60 }
 0x18e   : > { %1093 = vmatprep.mubr.f32.mxu0 %v1563_v54 }
 0x191   : > { %v1018_v62 = vpop.permute.xlu0 %1017  ;;  %v1016_v63 = vpop.permute.xlu1 %1015  ;;  %1459 = vmatmul.mubr.msk.f32.vlgmr.msra.gmra.mrb[0].mxu1 %vm358_vm10, %v320_v61 }
 0x192   : > { %v1020_v0 = vsel %vm1019_vm13, %v1014_v39, %v1016_v63  ;;  %v1021_v1 = vsel %vm1019_vm13, %v1016_v63, %v1018_v62  ;;  %626 = vmatprep.mubr.f32.mxu1 %v1563_v54 }
 0x193   : > { %1482 = vmatprep.subr.msk.mxu0 %vm362_vm9, %v1021_v1 }
 0x194   : > { %1483 = vmatpush1.msk.msra.mxu0 %vm362_vm9, %v1020_v0 }
 0x195   : > { %v549_v3 = vpop.permute.xlu0 %548  ;;  %v551_v4 = vpop.permute.xlu1 %550  ;;  %1484 = vmatmul.mubr.msk.f32.vlgmr.msra.gmra.mrb[0].mxu0 %vm358_vm10, %v1481_v2 }
 0x196   : > { %v553_v5 = vsel %vm552_vm14, %v547_v49, %v549_v3  ;;  %v554_v8 = vsel %vm552_vm14, %v549_v3, %v551_v4  ;;  %1210 = vmatprep.mubr.f32.mxu0 %v1563_v54 }
 0x197   : > { %1462 = vmatprep.subr.msk.mxu1 %vm362_vm9, %v554_v8 }
 0x198   : > { %1463 = vmatpush1.msk.msra.mxu1 %vm362_vm9, %v553_v5 }
 0x199   : > { %v1133_v10 = vpop.permute.xlu0 %1132  ;;  %v1135_v11 = vpop.permute.xlu1 %1134  ;;  %1464 = vmatmul.mubr.msk.f32.vlgmr.msra.gmra.mrb[0].mxu1 %vm358_vm10, %v1461_v9 }
 0x19a   : > { %v1137_v12 = vsel %vm1136_vm15, %v1131_v57, %v1133_v10  ;;  %v1138_v13 = vsel %vm1136_vm15, %v1133_v10, %v1135_v11  ;;  %743 = vmatprep.mubr.f32.mxu1 %v1563_v54 }
 0x19b   : > { %1487 = vmatprep.subr.msk.mxu0 %vm362_vm9, %v1138_v13 }
 0x19c   : > { %1488 = vmatpush1.msk.msra.mxu0 %vm362_vm9, %v1137_v12 }
 0x19d   : > { %v666_v15 = vpop.permute.xlu0 %665  ;;  %v668_v16 = vpop.permute.xlu1 %667  ;;  %1489 = vmatmul.mubr.msk.f32.vlgmr.msra.gmra.mrb[0].mxu0 %vm358_vm10, %v1486_v14 }
 0x19e   : > { %v671_v17 = vsel %vm669_vm0, %v666_v15, %v668_v16  ;;  %1327 = vmatprep.mubr.f32.mxu0 %v1563_v54 }
 0x19f   : > { %1467 = vmatprep.subr.msk.mxu1 %vm362_vm9, %v671_v17 }
 0x1a1   : > { %v1250_v18 = vpop.permute.xlu0 %1249  ;;  %v1252_v19 = vpop.permute.xlu1 %1251 }
 0x1a2   : > { %v1255_v20 = vsel %vm1253_vm2, %v1250_v18, %v1252_v19 }
 0x1a3   : > { %1492 = vmatprep.subr.msk.mxu0 %vm362_vm9, %v1255_v20 }
 0x1a5   : > { %v664_v21 = vpop.permute.xlu0 %663  ;;  %v1248_v22 = vpop.permute.xlu1 %1247 }
 0x1a6   : > { %v670_v54 = vsel %vm669_vm0, %v664_v21, %v666_v15  ;;  %v1254_v25 = vsel %vm1253_vm2, %v1248_v22, %v1250_v18 }
 0x1a7   : > { %1468 = vmatpush1.msk.msra.mxu1 %vm362_vm9, %v670_v54  ;;  %1493 = vmatpush1.msk.msra.mxu0 %vm362_vm9, %v1254_v25 }
 0x1a8   : > { %1469 = vmatmul.mubr.msk.f32.vlgmr.msra.gmra.mrb[0].mxu1 %vm358_vm10, %v1466_v23  ;;  %1494 = vmatmul.mubr.msk.f32.vlgmr.msra.gmra.mrb[0].mxu0 %vm358_vm10, %v1491_v24 }
 0x27b   : > { %v745_v26 = vpop.f32.mrb[0].mxu1  ;;  %v1329_v27 = vpop.f32.mrb[0].mxu0 }
 0x27c   : > { %v1499_v28 = vadd.f32 %v1329_v27, %v745_v26  ;;  %v747_v29 = vpop.f32.mrb[1].mxu1  ;;  %v1331_v30 = vpop.f32.mrb[1].mxu0 }
 0x27d   : > { %v1500_v31 = vadd.f32 %v1331_v30, %v747_v29 }
 0x27e   : > { %v1341_v32 = vsel %vm362_vm9, %v1499_v28, 0.0  ;;  %v1346_v33 = vmul.f32 %v1499_v28, %v1499_v28 }
 0x27f   : > { %v1338_v34 = vcombine.low %v1499_v28, %v1500_v31  ;;  %v1342_v35 = vsel %vm362_vm9, %v1500_v31, 0.0  ;;  %v1347_v36 = vmul.f32 %v1500_v31, %v1500_v31 }
 0x280   : > { %v1343_v37 = vadd.f32 %v1342_v35, %v1341_v32  ;;  %v1348_v38 = vsel %vm362_vm9, %v1346_v33, 0.0 }
 0x281   : > { %1340 = vst [vmem:[%s258_s18] sm:$0xff] %v1338_v34  ;;  %v1349_v39 = vsel %vm362_vm9, %v1347_v36, 0.0 }
 0x282   : > { %1344 = vadd.xlane.f32.xlu0 %v1343_v37  ;;  %v1350_v40 = vadd.f32 %v1349_v39, %v1348_v38 }
 0x284   : > { %1351 = vadd.xlane.f32.xlu1 %v1350_v40 }
 0x30f   : > { %v1345_v41 = vpop.xlane.xlu0 %1344 }
 0x311   : > { %v1352_v42 = vpop.xlane.xlu1 %1351 }
 0x312   : > { %v1353_v43 = vsel %vm336_vm1, %v1345_v41, %v1352_v42 }
 0x313   : > { %1355 = vst.msk [vmem:[%s262_s29] sm:$0xf] %vm1354_vm3, %v1353_v43 }
 0x314 PF: > { %s17_s21 = sadd.s32 1, %s1549_s21  }
 0x315   : > { %p14_p4 = scmp.ge.s32.totalorder %s17_s21, 4  }
 0x317   :  { %16 = sbr.rel (!%p14_p4) target bundleno = 1 (0x1), region = 98 }

</bundles_post_ra>
